<compile_context>
chip_gen: v6e
topology: v6e:2x2x1
jax: 0.10.0
libtpu: 0.0.40
codegen_flags: <defaults>
</compile_context>

<pallas_src>
import functools

import jax
import jax.numpy as jnp
from jax.experimental import pallas as pl
from jax.experimental.pallas import tpu as pltpu


def _round_up(v, m):
    return (v + m - 1) // m * m


def device_tuning():
    """Per-generation (block_m, block_h, vmem_limit_bytes)."""
    kind = ""
    try:
        kind = jax.devices()[0].device_kind.lower()
    except Exception:
        pass
    if "v7" in kind:                      # 64 MiB physical VMEM -> stay well under it
        return 256, 512, 48 * 1024 * 1024
    if "v6" in kind:                      # 128 MiB physical -> use the headroom
        return 512, 1024, 100 * 1024 * 1024
    if "v5e" in kind or "v5 lite" in kind or "v5lite" in kind:
        return 256, 512, 100 * 1024 * 1024
    return 256, 512, 64 * 1024 * 1024     # unknown / other: conservative


# ---------------------------------------------------------------------------
# Kernel: grouped expert MLP.
#   out[block] = gate_w[block] * (relu(x[block] @ W1[e] + b1[e]) @ W2[e] + b2[e])
# grid = (num_token_blocks "parallel", num_h_tiles "arbitrary").  Each token block
# belongs to exactly one expert (groups padded to block_m rows); the expert id and a
# per-block valid flag arrive via scalar prefetch.  The h axis is the trailing
# reduction axis for the second GEMM (f32 VMEM accumulator).  Fully-padded blocks
# skip all MXU work.
# ---------------------------------------------------------------------------
def _expert_mlp_kernel(blk_exp_ref, blk_valid_ref, x_ref, gw_ref,
                       w1_ref, b1_ref, w2_ref, b2_ref, out_ref, acc_ref):
    del blk_exp_ref  # only used inside the index_maps
    b = pl.program_id(0)
    j = pl.program_id(1)
    last_j = pl.num_programs(1) - 1
    valid = blk_valid_ref[b] != 0

    @pl.when(jnp.logical_and(valid, j == 0))
    def _():
        acc_ref[...] = jnp.zeros_like(acc_ref)

    @pl.when(valid)
    def _():
        # First GEMM for this h-tile (bf16 x bf16 -> f32), bias add + ReLU in f32.
        h = jnp.dot(x_ref[...], w1_ref[0],
                    preferred_element_type=jnp.float32) + b1_ref[0]
        h = jnp.maximum(h, 0.0)  # ReLU; Dropout is identity in eval mode
        # Second GEMM: accumulate this h-tile's contribution to d_out.
        acc_ref[...] += jnp.dot(h.astype(w2_ref.dtype), w2_ref[0],
                                preferred_element_type=jnp.float32)

    @pl.when(jnp.logical_and(valid, j == last_j))
    def _():
        # Fused gating weight (VPU mul is free under the MXU), bf16 writeback.
        out_ref[...] = ((acc_ref[...] + b2_ref[0]) * gw_ref[...]).astype(out_ref.dtype)

    @pl.when(jnp.logical_and(jnp.logical_not(valid), j == last_j))
    def _():
        out_ref[...] = jnp.zeros_like(out_ref)  # deterministic (never read back)


def grouped_expert_mlp(block_expert, block_valid, x_sorted, gate_w, w1, b1, w2, b2,
                       *, block_m, block_h, vmem_limit):
    """block_expert/block_valid: (num_blocks,) int32 (scalar prefetch);
    x_sorted: (P, Din_p) bf16, P = num_blocks*block_m; gate_w: (P, 1) f32;
    w1: (E, Din_p, H_p) bf16; b1: (E, 1, H_p) f32;
    w2: (E, H_p, Dout_p) bf16; b2: (E, 1, Dout_p) f32."""
    p_rows, d_in_p = x_sorted.shape
    h_p = w1.shape[2]
    d_out_p = w2.shape[2]
    num_blocks = p_rows // block_m
    n_h = h_p // block_h

    grid_spec = pltpu.PrefetchScalarGridSpec(
        num_scalar_prefetch=2,
        grid=(num_blocks, n_h),
        in_specs=[
            pl.BlockSpec((block_m, d_in_p), lambda b, j, be, bv: (b, 0)),
            pl.BlockSpec((block_m, 1), lambda b, j, be, bv: (b, 0)),
            pl.BlockSpec((1, d_in_p, block_h), lambda b, j, be, bv: (be[b], 0, j)),
            pl.BlockSpec((1, 1, block_h), lambda b, j, be, bv: (be[b], 0, j)),
            pl.BlockSpec((1, block_h, d_out_p), lambda b, j, be, bv: (be[b], j, 0)),
            pl.BlockSpec((1, 1, d_out_p), lambda b, j, be, bv: (be[b], 0, 0)),
        ],
        out_specs=pl.BlockSpec((block_m, d_out_p), lambda b, j, be, bv: (b, 0)),
        scratch_shapes=[pltpu.VMEM((block_m, d_out_p), jnp.float32)],
    )
    return pl.pallas_call(
        _expert_mlp_kernel,
        grid_spec=grid_spec,
        out_shape=jax.ShapeDtypeStruct((p_rows, d_out_p), jnp.bfloat16),
        compiler_params=pltpu.CompilerParams(
            # TODO(synk): on v7x verify the megacore split of the token-block axis is
            # contiguous in b (not strided) so each expert's weights stream on one TC.
            dimension_semantics=("parallel", "arbitrary"),
            vmem_limit_bytes=vmem_limit,
        ),
    )(block_expert, block_valid, x_sorted, gate_w, w1, b1, w2, b2)


# ---------------------------------------------------------------------------
# Full MoELayer forward: gate + top-k routing + sort (XLA glue), routed grouped
# GEMM with fused gating weight (Pallas), un-permute scatter-add (XLA glue).
# ---------------------------------------------------------------------------
@functools.partial(jax.jit, static_argnames=("top_k", "block_m", "block_h",
                                             "vmem_limit", "compute_dtype"))
def _moe_layer_forward_impl(x, params, top_k, block_m, block_h, vmem_limit,
                            compute_dtype):
    batch, seq, d_in = x.shape
    num_experts = params["wg"].shape[1]
    h_dim = params["w1"].shape[2]
    d_out = params["w2"].shape[2]
    x_flat = x.reshape(-1, d_in)
    n = x_flat.shape[0]
    k = top_k

    # ---- gating + routing (glue; tiny vs the expert GEMMs) ----
    gate_logits = x_flat @ params["wg"] + params["bg"]          # (N, E) f32
    topk_vals, topk_idx = jax.lax.top_k(gate_logits, k)          # (N, K)
    topk_w = jax.nn.softmax(topk_vals, axis=1)                   # (N, K) f32

    # ---- module side-state (matches PyTorch: top-1 bincount; not in output tensor) ----
    expert_counts = jnp.zeros((num_experts,), jnp.float32).at[topk_idx[:, 0]].add(1.0)
    router_probs = jax.nn.softmax(gate_logits, axis=1)
    per_expert = router_probs.sum(axis=0)
    cv = jnp.std(per_expert) / (jnp.mean(per_expert) + 1e-10)    # calculate_cv
    aux_loss = cv ** 2

    # ---- sort (token, k) assignments by expert; pad each expert group to block_m ----
    a = n * k
    flat_expert = topk_idx.reshape(-1).astype(jnp.int32)          # (A,)
    flat_token = jnp.repeat(jnp.arange(n, dtype=jnp.int32), k)    # (A,)
    flat_weight = topk_w.reshape(-1)                              # (A,)

    order = jnp.argsort(flat_expert)                              # stable sort
    sorted_expert = flat_expert[order]
    sorted_token = flat_token[order]
    sorted_weight = flat_weight[order]

    group_sizes = jnp.zeros((num_experts,), jnp.int32).at[flat_expert].add(1)
    padded_sizes = ((group_sizes + block_m - 1) // block_m) * block_m
    cum_padded = jnp.cumsum(padded_sizes)
    total_padded = cum_padded[-1]
    group_starts = jnp.concatenate(
        [jnp.zeros((1,), jnp.int32), cum_padded[:-1]])
    raw_starts = jnp.concatenate(
        [jnp.zeros((1,), jnp.int32), jnp.cumsum(group_sizes)[:-1]])
    rank = jnp.arange(a, dtype=jnp.int32) - raw_starts[sorted_expert]
    dest = group_starts[sorted_expert] + rank                     # (A,) unique positions

    num_blocks = (a + block_m - 1) // block_m + num_experts       # static upper bound
    p_rows = num_blocks * block_m

    block_start = jnp.arange(num_blocks, dtype=jnp.int32) * block_m
    # Tail (fully padded) blocks reuse the last real block's expert id -> no fresh
    # weight DMAs; a valid flag skips their compute inside the kernel.
    block_start_c = jnp.minimum(block_start, jnp.maximum(total_padded - 1, 0))
    block_expert = jnp.searchsorted(cum_padded, block_start_c,
                                    side="right").astype(jnp.int32)   # (num_blocks,)
    block_expert = jnp.minimum(block_expert, num_experts - 1)
    block_valid = (block_start < total_padded).astype(jnp.int32)       # (num_blocks,)

    # ---- pad feature dims to lane-dense multiples of 256 (full-width MXU on v6e/v7x) --
    d_in_p = _round_up(d_in, 256)
    bh = min(block_h, _round_up(h_dim, 256))
    h_p = _round_up(h_dim, bh)
    d_out_p = _round_up(d_out, 256)

    x_pad = jnp.pad(x_flat, ((0, 0), (0, d_in_p - d_in))).astype(compute_dtype)
    # TODO(synk): avoid materializing x_sorted in HBM — keep x in pl.ANY and gather the
    # block_m rows in-kernel with a double-buffered make_async_copy using a prefetched
    # per-block row-index table.
    x_sorted = jnp.zeros((p_rows, d_in_p), compute_dtype).at[dest].set(x_pad[sorted_token])
    gate_w_sorted = jnp.zeros((p_rows, 1), jnp.float32).at[dest].set(sorted_weight[:, None])

    w1_p = jnp.pad(params["w1"],
                   ((0, 0), (0, d_in_p - d_in), (0, h_p - h_dim))).astype(compute_dtype)
    b1_p = jnp.pad(params["b1"],
                   ((0, 0), (0, 0), (0, h_p - h_dim))).astype(jnp.float32)
    w2_p = jnp.pad(params["w2"],
                   ((0, 0), (0, h_p - h_dim), (0, d_out_p - d_out))).astype(compute_dtype)
    b2_p = jnp.pad(params["b2"],
                   ((0, 0), (0, 0), (0, d_out_p - d_out))).astype(jnp.float32)

    # ---- routed grouped GEMM with fused gating weight (Pallas, the hot path) ----
    out_sorted = grouped_expert_mlp(block_expert, block_valid, x_sorted, gate_w_sorted,
                                    w1_p, b1_p, w2_p, b2_p,
                                    block_m=block_m, block_h=bh,
                                    vmem_limit=vmem_limit)       # (P, Dout_p) bf16

    # ---- un-permute: gather each assignment's (already weighted) output, scatter-add
    #      per token in f32 ----
    y = out_sorted[dest].astype(jnp.float32)[:, :d_out]
    out_flat = jnp.zeros((n, d_out), jnp.float32).at[sorted_token].add(y)
    return out_flat.reshape(batch, seq, d_out), aux_loss, expert_counts


def moe_layer_forward(x, params, top_k, block_m=None, block_h=None, vmem_limit=None,
                      compute_dtype=jnp.bfloat16):
    t_bm, t_bh, t_vmem = device_tuning()
    return _moe_layer_forward_impl(
        x, params, top_k,
        block_m=block_m if block_m is not None else t_bm,
        block_h=block_h if block_h is not None else t_bh,
        vmem_limit=vmem_limit if vmem_limit is not None else t_vmem,
        compute_dtype=compute_dtype)


# ---------------------------------------------------------------------------
# Pure-JAX reference (mirrors the PyTorch per-token loop, vectorized/dense).
# compute_dtype=bf16 mirrors the kernel's operand rounding for a tight comparison.
# ---------------------------------------------------------------------------
def moe_layer_reference(x, params, top_k, compute_dtype=jnp.float32):
    b, s, d_in = x.shape
    num_experts = params["wg"].shape[1]
    x_flat = x.reshape(-1, d_in)
    gate_logits = x_flat @ params["wg"] + params["bg"]
    topk_vals, topk_idx = jax.lax.top_k(gate_logits, top_k)
    topk_w = jax.nn.softmax(topk_vals, axis=1)
    cast = lambda t: t.astype(compute_dtype).astype(jnp.float32)
    xc, w1c, w2c = cast(x_flat), cast(params["w1"]), cast(params["w2"])
    h = jnp.maximum(jnp.einsum("nd,edh->enh", xc, w1c) + params["b1"], 0.0)
    y = jnp.einsum("enh,eho->eno", cast(h), w2c) + params["b2"]    # (E, N, Dout)
    onehot = jax.nn.one_hot(topk_idx, num_experts, dtype=jnp.float32)
    comb = jnp.einsum("nk,nke->en", topk_w, onehot)                # (E, N)
    out = jnp.einsum("en,eno->no", comb, y)
    return out.reshape(b, s, -1)


# ---------------------------------------------------------------------------
def init_params(key, input_dim, output_dim, hidden_dim, num_experts):
    ks = jax.random.split(key, 6)
    scale1 = 1.0 / jnp.sqrt(input_dim)
    scale2 = 1.0 / jnp.sqrt(hidden_dim)
    return {
        "wg": jax.random.uniform(ks[0], (input_dim, num_experts), jnp.float32, -scale1, scale1),
        "bg": jax.random.uniform(ks[1], (1, num_experts), jnp.float32, -scale1, scale1),
        "w1": jax.random.uniform(ks[2], (num_experts, input_dim, hidden_dim), jnp.float32, -scale1, scale1),
        "b1": jax.random.uniform(ks[3], (num_experts, 1, hidden_dim), jnp.float32, -scale1, scale1),
        "w2": jax.random.uniform(ks[4], (num_experts, hidden_dim, output_dim), jnp.float32, -scale2, scale2),
        "b2": jax.random.uniform(ks[5], (num_experts, 1, output_dim), jnp.float32, -scale2, scale2),
    }


if __name__ == "__main__":
    # Note: the PyTorch forward writes output_dim-sized vectors into a buffer shaped
    # like x_reshaped, so it implicitly requires output_dim == input_dim.
    batch, seq = 2, 8
    input_dim = 32
    output_dim = 32
    num_experts = 4
    top_k = 2
    hidden_dim = 2 * input_dim  # default expert_hidden_dim

    key = jax.random.PRNGKey(0)
    kx, kp = jax.random.split(key)
    x = jax.random.normal(kx, (batch, seq, input_dim), dtype=jnp.float32)
    params = init_params(kp, input_dim, output_dim, hidden_dim, num_experts)

    out, aux_loss, expert_counts = moe_layer_forward(x, params, top_k=top_k)
    out = jax.block_until_ready(out)

    ref = moe_layer_reference(x, params, top_k, compute_dtype=jnp.bfloat16)
    assert out.shape == (batch, seq, output_dim)
    assert bool(jnp.isfinite(out).all())
    max_err = float(jnp.max(jnp.abs(out - ref)))
    assert jnp.allclose(out, ref, atol=1e-2, rtol=1e-2), f"mismatch vs reference (max abs err {max_err})"

    print("KERNEL_OK")
</pallas_src>

<mosaic_0001>
module attributes {stable_mosaic.version = 11 : i64} {
  func.func private @main(%arg0: i32) attributes {dimension_semantics = [#tpu.dimension_semantics<core_parallel>], iteration_bounds = array<i64: 2>, tpu.core_type = #tpu.core_type<sc_scalar_subcore>, window_params = []} {
    return
  }
}

module attributes {stable_mosaic.version = 11 : i64} {
  func.func private @main(%arg0: i32) attributes {dimension_semantics = [#tpu.dimension_semantics<core_parallel>], iteration_bounds = array<i64: 2>, tpu.core_type = #tpu.core_type<sc_scalar_subcore>, window_params = []} {
    return
  }
}

module attributes {stable_mosaic.version = 11 : i64} {
  func.func @_expert_mlp_kernel(%arg0: i32, %arg1: i32, %arg2: memref<5xi32, #tpu.memory_space<smem>>, %arg3: memref<5xi32, #tpu.memory_space<smem>>, %arg4: memref<256x256xbf16, #tpu.memory_space<vmem>>, %arg5: memref<256x1xf32, #tpu.memory_space<vmem>>, %arg6: memref<1x256x256xbf16, #tpu.memory_space<vmem>>, %arg7: memref<1x1x256xf32, #tpu.memory_space<vmem>>, %arg8: memref<1x256x256xbf16, #tpu.memory_space<vmem>>, %arg9: memref<1x1x256xf32, #tpu.memory_space<vmem>>, %arg10: memref<256x256xbf16, #tpu.memory_space<vmem>>, %arg11: memref<256x256xf32, #tpu.memory_space<vmem>>) attributes {dimension_semantics = [#tpu.dimension_semantics<parallel>, #tpu.dimension_semantics<arbitrary>], iteration_bounds = array<i64: 5, 1>, scalar_prefetch = 2 : i64, scratch_operands = 1 : i64, tpu.core_type = #tpu.core_type<tc>, window_params = [{transform_indices = @transform_0, window_bounds = array<i64: 256, 256>}, {transform_indices = @transform_1, window_bounds = array<i64: 256, 1>}, {transform_indices = @transform_2, window_bounds = array<i64: 1, 256, 256>}, {transform_indices = @transform_3, window_bounds = array<i64: 1, 1, 256>}, {transform_indices = @transform_4, window_bounds = array<i64: 1, 256, 256>}, {transform_indices = @transform_5, window_bounds = array<i64: 1, 1, 256>}, {transform_indices = @transform_6, window_bounds = array<i64: 256, 256>}]} {
    %0 = arith.index_cast %arg0 : i32 to index
    %1 = memref.load %arg3[%0] : memref<5xi32, #tpu.memory_space<smem>>
    %c0_i32 = arith.constant 0 : i32
    %2 = arith.cmpi ne, %1, %c0_i32 : i32
    %c0_i32_0 = arith.constant 0 : i32
    %3 = arith.cmpi eq, %arg1, %c0_i32_0 : i32
    %4 = arith.andi %2, %3 : i1
    %5 = arith.extui %4 : i1 to i32
    %c0_i32_1 = arith.constant 0 : i32
    %6 = arith.cmpi ne, %5, %c0_i32_1 : i32
    scf.if %6 {
      %cst = arith.constant 0.000000e+00 : f32
      %18 = vector.broadcast %cst : f32 to vector<256x256xf32>
      %c0 = arith.constant 0 : index
      %c0_7 = arith.constant 0 : index
      %19 = vector.load %arg11[%c0, %c0_7] : memref<256x256xf32, #tpu.memory_space<vmem>>, vector<256x256xf32>
      tpu.vector_store %arg11[%c0, %c0_7], %18 {strides = array<i32>} : memref<256x256xf32, #tpu.memory_space<vmem>>, vector<256x256xf32>,
    } else {
    }
    %7 = arith.extui %2 : i1 to i32
    %c0_i32_2 = arith.constant 0 : i32
    %8 = arith.cmpi ne, %7, %c0_i32_2 : i32
    scf.if %8 {
      %c0 = arith.constant 0 : index
      %c0_7 = arith.constant 0 : index
      %18 = vector.load %arg4[%c0, %c0_7] : memref<256x256xbf16, #tpu.memory_space<vmem>>, vector<256x256xbf16>
      %c0_8 = arith.constant 0 : index
      %c0_9 = arith.constant 0 : index
      %c0_10 = arith.constant 0 : index
      %19 = vector.load %arg6[%c0_8, %c0_9, %c0_10] : memref<1x256x256xbf16, #tpu.memory_space<vmem>>, vector<1x256x256xbf16>
      %20 = vector.shape_cast %19 : vector<1x256x256xbf16> to vector<256x256xbf16>
      %cst = arith.constant dense<0.000000e+00> : vector<256x256xf32>
      %21 = tpu.matmul %18, %20, %cst {dimension_numbers = #tpu.dot_dimension_numbers<[1], [0], [0], [1], [0, 0, 1, 1], [], []>} : vector<256x256xbf16>, vector<256x256xbf16>, vector<256x256xf32> -> vector<256x256xf32>
      %c0_11 = arith.constant 0 : index
      %c0_12 = arith.constant 0 : index
      %c0_13 = arith.constant 0 : index
      %22 = vector.load %arg7[%c0_11, %c0_12, %c0_13] : memref<1x1x256xf32, #tpu.memory_space<vmem>>, vector<1x1x256xf32>
      %23 = vector.shape_cast %22 : vector<1x1x256xf32> to vector<1x256xf32>
      %24 = vector.broadcast %23 : vector<1x256xf32> to vector<256x256xf32>
      %25 = arith.addf %21, %24 : vector<256x256xf32>
      %cst_14 = arith.constant 0.000000e+00 : f32
      %26 = vector.broadcast %cst_14 : f32 to vector<256x256xf32>
      %27 = arith.maximumf %25, %26 : vector<256x256xf32>
      %c0_15 = arith.constant 0 : index
      %c0_16 = arith.constant 0 : index
      %28 = vector.load %arg11[%c0_15, %c0_16] : memref<256x256xf32, #tpu.memory_space<vmem>>, vector<256x256xf32>
      %29 = arith.truncf %27 : vector<256x256xf32> to vector<256x256xbf16>
      %c0_17 = arith.constant 0 : index
      %c0_18 = arith.constant 0 : index
      %c0_19 = arith.constant 0 : index
      %30 = vector.load %arg8[%c0_17, %c0_18, %c0_19] : memref<1x256x256xbf16, #tpu.memory_space<vmem>>, vector<1x256x256xbf16>
      %31 = vector.shape_cast %30 : vector<1x256x256xbf16> to vector<256x256xbf16>
      %cst_20 = arith.constant dense<0.000000e+00> : vector<256x256xf32>
      %32 = tpu.matmul %29, %31, %cst_20 {dimension_numbers = #tpu.dot_dimension_numbers<[1], [0], [0], [1], [0, 0, 1, 1], [], []>} : vector<256x256xbf16>, vector<256x256xbf16>, vector<256x256xf32> -> vector<256x256xf32>
      %33 = arith.addf %28, %32 : vector<256x256xf32>
      %c0_21 = arith.constant 0 : index
      %c0_22 = arith.constant 0 : index
      %34 = vector.load %arg11[%c0_21, %c0_22] : memref<256x256xf32, #tpu.memory_space<vmem>>, vector<256x256xf32>
      tpu.vector_store %arg11[%c0_21, %c0_22], %33 {strides = array<i32>} : memref<256x256xf32, #tpu.memory_space<vmem>>, vector<256x256xf32>,
    } else {
    }
    %c0_i32_3 = arith.constant 0 : i32
    %9 = arith.cmpi eq, %arg1, %c0_i32_3 : i32
    %10 = arith.andi %2, %9 : i1
    %11 = arith.extui %10 : i1 to i32
    %c0_i32_4 = arith.constant 0 : i32
    %12 = arith.cmpi ne, %11, %c0_i32_4 : i32
    scf.if %12 {
      %c0 = arith.constant 0 : index
      %c0_7 = arith.constant 0 : index
      %18 = vector.load %arg11[%c0, %c0_7] : memref<256x256xf32, #tpu.memory_space<vmem>>, vector<256x256xf32>
      %c0_8 = arith.constant 0 : index
      %c0_9 = arith.constant 0 : index
      %c0_10 = arith.constant 0 : index
      %19 = vector.load %arg9[%c0_8, %c0_9, %c0_10] : memref<1x1x256xf32, #tpu.memory_space<vmem>>, vector<1x1x256xf32>
      %20 = vector.shape_cast %19 : vector<1x1x256xf32> to vector<1x256xf32>
      %21 = vector.broadcast %20 : vector<1x256xf32> to vector<256x256xf32>
      %22 = arith.addf %18, %21 : vector<256x256xf32>
      %c0_11 = arith.constant 0 : index
      %c0_12 = arith.constant 0 : index
      %23 = vector.load %arg5[%c0_11, %c0_12] : memref<256x1xf32, #tpu.memory_space<vmem>>, vector<256x1xf32>
      %24 = vector.broadcast %23 : vector<256x1xf32> to vector<256x256xf32>
      %25 = arith.mulf %22, %24 : vector<256x256xf32>
      %26 = arith.truncf %25 : vector<256x256xf32> to vector<256x256xbf16>
      %c0_13 = arith.constant 0 : index
      %c0_14 = arith.constant 0 : index
      %27 = vector.load %arg10[%c0_13, %c0_14] : memref<256x256xbf16, #tpu.memory_space<vmem>>, vector<256x256xbf16>
      tpu.vector_store %arg10[%c0_13, %c0_14], %26 {strides = array<i32>} : memref<256x256xbf16, #tpu.memory_space<vmem>>, vector<256x256xbf16>,
    } else {
    }
    %true = arith.constant true
    %13 = arith.xori %2, %true : i1
    %c0_i32_5 = arith.constant 0 : i32
    %14 = arith.cmpi eq, %arg1, %c0_i32_5 : i32
    %15 = arith.andi %13, %14 : i1
    %16 = arith.extui %15 : i1 to i32
    %c0_i32_6 = arith.constant 0 : i32
    %17 = arith.cmpi ne, %16, %c0_i32_6 : i32
    scf.if %17 {
      %cst = arith.constant 0.000000e+00 : bf16
      %18 = vector.broadcast %cst : bf16 to vector<256x256xbf16>
      %c0 = arith.constant 0 : index
      %c0_7 = arith.constant 0 : index
      %19 = vector.load %arg10[%c0, %c0_7] : memref<256x256xbf16, #tpu.memory_space<vmem>>, vector<256x256xbf16>
      tpu.vector_store %arg10[%c0, %c0_7], %18 {strides = array<i32>} : memref<256x256xbf16, #tpu.memory_space<vmem>>, vector<256x256xbf16>,
    } else {
    }
    return
  }
  func.func @transform_0(%arg0: i32, %arg1: i32, %arg2: memref<5xi32, #tpu.memory_space<smem>>, %arg3: memref<5xi32, #tpu.memory_space<smem>>) -> (i32, i32) {
    %c0_i32 = arith.constant 0 : i32
    %c0_i32_0 = arith.constant 0 : i32
    return %arg0, %c0_i32 : i32, i32
  }
  func.func @transform_1(%arg0: i32, %arg1: i32, %arg2: memref<5xi32, #tpu.memory_space<smem>>, %arg3: memref<5xi32, #tpu.memory_space<smem>>) -> (i32, i32) {
    %c0_i32 = arith.constant 0 : i32
    %c0_i32_0 = arith.constant 0 : i32
    return %arg0, %c0_i32 : i32, i32
  }
  func.func @transform_2(%arg0: i32, %arg1: i32, %arg2: memref<5xi32, #tpu.memory_space<smem>>, %arg3: memref<5xi32, #tpu.memory_space<smem>>) -> (i32, i32, i32) {
    %0 = arith.index_cast %arg0 : i32 to index
    %1 = memref.load %arg2[%0] : memref<5xi32, #tpu.memory_space<smem>>
    %c0_i32 = arith.constant 0 : i32
    %c0_i32_0 = arith.constant 0 : i32
    return %1, %c0_i32, %arg1 : i32, i32, i32
  }
  func.func @transform_3(%arg0: i32, %arg1: i32, %arg2: memref<5xi32, #tpu.memory_space<smem>>, %arg3: memref<5xi32, #tpu.memory_space<smem>>) -> (i32, i32, i32) {
    %0 = arith.index_cast %arg0 : i32 to index
    %1 = memref.load %arg2[%0] : memref<5xi32, #tpu.memory_space<smem>>
    %c0_i32 = arith.constant 0 : i32
    %c0_i32_0 = arith.constant 0 : i32
    return %1, %c0_i32, %arg1 : i32, i32, i32
  }
  func.func @transform_4(%arg0: i32, %arg1: i32, %arg2: memref<5xi32, #tpu.memory_space<smem>>, %arg3: memref<5xi32, #tpu.memory_space<smem>>) -> (i32, i32, i32) {
    %0 = arith.index_cast %arg0 : i32 to index
    %1 = memref.load %arg2[%0] : memref<5xi32, #tpu.memory_space<smem>>
    %c0_i32 = arith.constant 0 : i32
    %c0_i32_0 = arith.constant 0 : i32
    return %1, %arg1, %c0_i32 : i32, i32, i32
  }
  func.func @transform_5(%arg0: i32, %arg1: i32, %arg2: memref<5xi32, #tpu.memory_space<smem>>, %arg3: memref<5xi32, #tpu.memory_space<smem>>) -> (i32, i32, i32) {
    %0 = arith.index_cast %arg0 : i32 to index
    %1 = memref.load %arg2[%0] : memref<5xi32, #tpu.memory_space<smem>>
    %c0_i32 = arith.constant 0 : i32
    %c0_i32_0 = arith.constant 0 : i32
    %c0_i32_1 = arith.constant 0 : i32
    return %1, %c0_i32, %c0_i32_0 : i32, i32, i32
  }
  func.func @transform_6(%arg0: i32, %arg1: i32, %arg2: memref<5xi32, #tpu.memory_space<smem>>, %arg3: memref<5xi32, #tpu.memory_space<smem>>) -> (i32, i32) {
    %c0_i32 = arith.constant 0 : i32
    %c0_i32_0 = arith.constant 0 : i32
    return %arg0, %c0_i32 : i32, i32
  }
}

</mosaic_0001>

<bundles_post_ra>
// kernel: custom-call.1
= control target key start
LH: loop header
LB: loop body
LE: loop exit
PB: predicated region body
PF: predicated region fallthrough
CT: control target
= control target key end

     0   :  { %s6_s0 = inlined_call_operand.vmem [shape: u32[5], index: 0, kind: output, shape index: {}]  }

// kernel: _moe_layer_forward_impl.1
= control target key start
LH: loop header
LB: loop body
LE: loop exit
PB: predicated region body
PF: predicated region fallthrough
CT: control target
= control target key end

     0   :  { %s3539_s0 = inlined_call_operand.vmem [shape: s32[5], index: 0, kind: input, shape index: {}]   ;;  %s3540_s2 = inlined_call_operand.vmem [shape: bf16[1280,256], index: 2, kind: input, shape index: {}]   ;;  %s3541_s3 = inlined_call_operand.vmem [shape: f32[1280,1], index: 3, kind: input, shape index: {}]   ;;  %s3542_s4 = inlined_call_operand.vmem [shape: bf16[4,256,256], index: 4, kind: input, shape index: {}]   ;;  %s3543_s5 = inlined_call_operand.vmem [shape: f32[4,1,256], index: 5, kind: input, shape index: {}]   ;;  %s3544_s6 = inlined_call_operand.vmem [shape: bf16[4,256,256], index: 6, kind: input, shape index: {}]   ;;  %s3545_s7 = inlined_call_operand.vmem [shape: f32[4,1,256], index: 7, kind: input, shape index: {}]   ;;  %s3546_s8 = inlined_call_operand.vmem [shape: bf16[1280,256], index: 8, kind: output, shape index: {}]   ;;  %s3547_s1 = inlined_call_operand.vmem [shape: s32[5], index: 1, kind: input, shape index: {}]  }
   0x1   :  { %s13_s29 = sshll.u32 %s3539_s0, 4  ;;  %s17_s10 = sshll.u32 %s3547_s1, 4  ;;  %s14_s29 = int_to_ptr.vmem [resolvable:$true] %s13_s29  ;;  %s18_s10 = int_to_ptr.vmem [resolvable:$true] %s17_s10 }
   0x2   :  { %s2965_s11 = scalar_lea.vmem %s14_s29, 16  ;;  %p2970_p1 = scmp.lt.s32.totalorder %s14_s29, %s14_s29 }
   0x3   :  { %p2966_p0 = scmp.ne.s32.totalorder %s14_s29, %s2965_s11  ;;  %p2971_p2 = scmp.lt.s32.totalorder %s2965_s11, %s2965_s11 }
   0x5   :  { %p2972_p3 = por %p2971_p2, %p2970_p1 }
   0x7   :  { %p2973_p4 = pnand %p2972_p3, %p2966_p0 }
   0x9   :  { %2976 = shalt.err (!%p2973_p4)  }
   0xa   :  { %s3015_s12 = smov [#allocation4]   ;;  %s2977_s13 = scalar_lea.vmem %s18_s10, 16 }
   0xb   :  { %16 = dma.vmem_to_smem %s14_s29, 16, %s3015_s12, [#allocation3] }
   0xc   :  { %p2978_p5 = scmp.ne.s32.totalorder %s18_s10, %s2977_s13  ;;  %p2982_p6 = scmp.lt.s32.totalorder %s18_s10, %s18_s10 }
   0xd   :  { %p2983_p7 = scmp.lt.s32.totalorder %s2977_s13, %s2977_s13 }
   0xf   :  { %p2984_p8 = por %p2983_p7, %p2982_p6 }
  0x11   :  { %p2985_p9 = pnand %p2984_p8, %p2978_p5 }
  0x13   :  { %2988 = shalt.err (!%p2985_p9)  }
  0x14   :  { %s3016_s0 = smov [#allocation5]  }
  0x15   :  { %20 = dma.vmem_to_smem %s18_s10, 16, %s3016_s0, [#allocation3] }
  0x16   :  { %3001 = dma.done.wait [#allocation3], 32 }
  0x17   :  { %3002 = vsyncadd [#allocation3], 4294967264 }
  0x18   :  { %22 = sfence }
  0x19   :  { %s3071_s1 = smov 0   ;;  %s3073_s14 = smov 0  }
  0x1a   :  { %s3075_s15 = smov 0  }
  0x1b LB: > { %s40_s16 = sadd.s32 1, %s3009_s14  ;;  %p2604_p10 = scmp.ge.s32.totalorder %s3013_s15, 1  ;;  %s3013_s15 = sphi %s3075_s15, %s28_s15   ;;  %s3009_s14 = sphi %s3073_s14, %s3549_s14   ;;  %s3005_s1 = sphi %s3071_s1, %s3548_s1  }
  0x1c   : > { %p42_p11 = scmp.ge.s32.totalorder %s40_s16, 5  ;;  %p325_p12 = scmp.lt.s32.totalorder %s3013_s15, 6 }
  0x1e   : > { %s3551_s16 = smov (%p42_p11, %s40_s16), 0  ;;  %p326_p13 = pnand %p2604_p10, %p325_p12 }
  0x1f   : > { %s2605_s17 = sshll.u32 (!%p326_p13), %s3005_s1, 5  ;;  %s410_s18 = sld [smem:[#allocation4 + %s3005_s1]] (!%p326_p13) }
  0x20   : > { %329 = sbr.rel (%p326_p13) target bundleno = 887 (0x377), region = 44  ;;  %p398_p0 = scmp.lt.s32.totalorder (!%p326_p13), %s2605_s17, 159 }
  0x21   : > { %s422_s19 = sld [smem:[#allocation4 + %s3005_s1]] (!%p326_p13) }
  0x22   : > { %s433_s20 = sld [smem:[#allocation4 + %s3005_s1]] (!%p326_p13) }
  0x23   : > { %s446_s21 = sld [smem:[#allocation4 + %s3005_s1]] (!%p326_p13) }
  0x24   : > { %s3089_s23 = sld [smem:[#allocation5 + %s3005_s1]] (!%p326_p13) }
  0x25   : > { %s3553_s17 = smov (!%p398_p0, %s2605_s17), 159  ;;  %p412_p1 = scmp.lt.s32.totalorder %s410_s18, 3 }
  0x26   : > { %s2752_s22 = sshll.u32 %s3553_s17, 3 }
  0x27   : > { %s3094_s26 = scalar_lea.vmem %s3540_s2, %s2752_s22  ;;  %s3099_s29 = scalar_lea.vmem %s3541_s3, %s2752_s22 }
  0x28   : > { %p424_p2 = scmp.lt.s32.totalorder %s422_s19, 3  ;;  %p435_p3 = scmp.lt.s32.totalorder %s433_s20, 3 }
  0x29   : > { %s3104_s10 = scalar_lea.vmem %s3546_s8, %s2752_s22  ;;  %s3555_s18 = smov (!%p412_p1, %s410_s18), 3 }
  0x2a   : > { %s3557_s19 = smov (!%p424_p2, %s422_s19), 3  ;;  %s2753_s11 = sshll.u32 %s3555_s18, 8 }
  0x2b   : > { %p447_p4 = scmp.lt.s32.totalorder %s446_s21, 3  ;;  %s3109_s0 = scalar_lea.vmem %s3542_s4, %s2753_s11 }
  0x2c   : > { %s2612_s1 = sshll.u32 %s3557_s19, 1  ;;  %p461_p5 = scmp.ne.s32.totalorder %s3089_s23, 0 }
  0x2d   : > { %s3114_s25 = scalar_lea.vmem %s3543_s5, %s2612_s1  ;;  %s3559_s20 = smov (!%p435_p3, %s433_s20), 3  ;;  %v3017_v0 = vmov (%p461_p5), 0.0  }
  0x2e   : > { %s3561_s21 = smov (!%p447_p4, %s446_s21), 3  ;;  %s2754_s22 = sshll.u32 %s3559_s20, 8  ;;  %467 = vst [vmem:[#allocation2 + $0xb0] sm:$0xff] (%p461_p5), %v3017_v0  ;;  %468 = vst [vmem:[#allocation2 + $0x1b0] sm:$0xff] (%p461_p5), %v3017_v0 }
  0x2f   : > { %s3120_s18 = scalar_lea.vmem %s3544_s6, %s2754_s22  ;;  %s2615_s30 = sshll.u32 %s3561_s21, 1  ;;  %469 = vst [vmem:[#allocation2 + $0xd8] sm:$0xff] (%p461_p5), %v3017_v0  ;;  %470 = vst [vmem:[#allocation2 + $0x18] sm:$0xff] (%p461_p5), %v3017_v0 }
  0x30   : > { %s3125_s11 = scalar_lea.vmem %s3545_s7, %s2615_s30  ;;  %466 = sbr.rel (!%p461_p5) target bundleno = 78 (0x4e), region = 48  ;;  %471 = vst [vmem:[#allocation2 + $0x50] sm:$0xff] (%p461_p5), %v3017_v0  ;;  %472 = vst [vmem:[#allocation2 + $0x168] sm:$0xff] (%p461_p5), %v3017_v0 }
  0x31   : > { %473 = vst [vmem:[#allocation2 + $0x130] sm:$0xff] (%p461_p5), %v3017_v0  ;;  %474 = vst [vmem:[#allocation2 + $0x48] sm:$0xff] (%p461_p5), %v3017_v0 }
  0x32   : > { %475 = vst [vmem:[#allocation2 + $0x180] sm:$0xff] (%p461_p5), %v3017_v0  ;;  %476 = vst [vmem:[#allocation2 + $0x110] sm:$0xff] (%p461_p5), %v3017_v0 }
  0x33   : > { %477 = vst [vmem:[#allocation2 + $0x118] sm:$0xff] (%p461_p5), %v3017_v0  ;;  %478 = vst [vmem:[#allocation2 + $0x98] sm:$0xff] (%p461_p5), %v3017_v0 }
  0x34   : > { %479 = vst [vmem:[#allocation2 + $0x120] sm:$0xff] (%p461_p5), %v3017_v0  ;;  %480 = vst [vmem:[#allocation2 + $0x150] sm:$0xff] (%p461_p5), %v3017_v0 }
  0x35   : > { %481 = vst [vmem:[#allocation2 + $0x108] sm:$0xff] %v3017_v0  ;;  %482 = vst [vmem:[#allocation2 + $0x60] sm:$0xff] %v3017_v0 }
  0x36   : > { %483 = vst [vmem:[#allocation2 + $0xe0] sm:$0xff] %v3017_v0  ;;  %484 = vst [vmem:[#allocation2 + $0x188] sm:$0xff] %v3017_v0 }
  0x37   : > { %485 = vst [vmem:[#allocation2 + $0x138] sm:$0xff] %v3017_v0  ;;  %486 = vst [vmem:[#allocation2 + $0x140] sm:$0xff] %v3017_v0 }
  0x38   : > { %487 = vst [vmem:[#allocation2 + $0x80] sm:$0xff] %v3017_v0  ;;  %488 = vst [vmem:[#allocation2 + $0x1a8] sm:$0xff] %v3017_v0 }
  0x39   : > { %489 = vst [vmem:[#allocation2 + $0x1b8] sm:$0xff] %v3017_v0  ;;  %490 = vst [vmem:[#allocation2 + $0x28] sm:$0xff] %v3017_v0 }
  0x3a   : > { %491 = vst [vmem:[#allocation2 + $0x1e8] sm:$0xff] %v3017_v0  ;;  %492 = vst [vmem:[#allocation2 + $0xf8] sm:$0xff] %v3017_v0 }
  0x3b   : > { %493 = vst [vmem:[#allocation2 + $0x160] sm:$0xff] %v3017_v0  ;;  %494 = vst [vmem:[#allocation2 + $0x30] sm:$0xff] %v3017_v0 }
  0x3c   : > { %495 = vst [vmem:[#allocation2 + $0x1e0] sm:$0xff] %v3017_v0  ;;  %496 = vst [vmem:[#allocation2] sm:$0xff] %v3017_v0 }
  0x3d   : > { %497 = vst [vmem:[#allocation2 + $0xf0] sm:$0xff] %v3017_v0  ;;  %498 = vst [vmem:[#allocation2 + $0x8] sm:$0xff] %v3017_v0 }
  0x3e   : > { %499 = vst [vmem:[#allocation2 + $0x148] sm:$0xff] %v3017_v0  ;;  %500 = vst [vmem:[#allocation2 + $0x1d0] sm:$0xff] %v3017_v0 }
  0x3f   : > { %501 = vst [vmem:[#allocation2 + $0x100] sm:$0xff] %v3017_v0  ;;  %502 = vst [vmem:[#allocation2 + $0xc8] sm:$0xff] %v3017_v0 }
  0x40   : > { %503 = vst [vmem:[#allocation2 + $0x40] sm:$0xff] %v3017_v0  ;;  %504 = vst [vmem:[#allocation2 + $0x1f8] sm:$0xff] %v3017_v0 }
  0x41   : > { %505 = vst [vmem:[#allocation2 + $0x20] sm:$0xff] %v3017_v0  ;;  %506 = vst [vmem:[#allocation2 + $0x128] sm:$0xff] %v3017_v0 }
  0x42   : > { %507 = vst [vmem:[#allocation2 + $0x1a0] sm:$0xff] %v3017_v0  ;;  %508 = vst [vmem:[#allocation2 + $0x1f0] sm:$0xff] %v3017_v0 }
  0x43   : > { %509 = vst [vmem:[#allocation2 + $0xe8] sm:$0xff] %v3017_v0  ;;  %510 = vst [vmem:[#allocation2 + $0x78] sm:$0xff] %v3017_v0 }
  0x44   : > { %511 = vst [vmem:[#allocation2 + $0x70] sm:$0xff] %v3017_v0  ;;  %512 = vst [vmem:[#allocation2 + $0x90] sm:$0xff] %v3017_v0 }
  0x45   : > { %513 = vst [vmem:[#allocation2 + $0x1d8] sm:$0xff] %v3017_v0  ;;  %514 = vst [vmem:[#allocation2 + $0xd0] sm:$0xff] %v3017_v0 }
  0x46   : > { %515 = vst [vmem:[#allocation2 + $0xb8] sm:$0xff] %v3017_v0  ;;  %516 = vst [vmem:[#allocation2 + $0x88] sm:$0xff] %v3017_v0 }
  0x47   : > { %517 = vst [vmem:[#allocation2 + $0xa8] sm:$0xff] %v3017_v0  ;;  %518 = vst [vmem:[#allocation2 + $0x1c8] sm:$0xff] %v3017_v0 }
  0x48   : > { %519 = vst [vmem:[#allocation2 + $0x170] sm:$0xff] %v3017_v0  ;;  %520 = vst [vmem:[#allocation2 + $0x178] sm:$0xff] %v3017_v0 }
  0x49   : > { %521 = vst [vmem:[#allocation2 + $0x68] sm:$0xff] %v3017_v0  ;;  %522 = vst [vmem:[#allocation2 + $0x190] sm:$0xff] %v3017_v0 }
  0x4a   : > { %523 = vst [vmem:[#allocation2 + $0x198] sm:$0xff] %v3017_v0  ;;  %524 = vst [vmem:[#allocation2 + $0x38] sm:$0xff] %v3017_v0 }
  0x4b   : > { %525 = vst [vmem:[#allocation2 + $0xc0] sm:$0xff] %v3017_v0  ;;  %526 = vst [vmem:[#allocation2 + $0x1c0] sm:$0xff] %v3017_v0 }
  0x4c   : > { %527 = vst [vmem:[#allocation2 + $0x158] sm:$0xff] %v3017_v0  ;;  %528 = vst [vmem:[#allocation2 + $0x10] sm:$0xff] %v3017_v0 }
  0x4d   : > { %529 = vst [vmem:[#allocation2 + $0x58] sm:$0xff] %v3017_v0  ;;  %530 = vst [vmem:[#allocation2 + $0xa0] sm:$0xff] %v3017_v0 }
  0x4e PF: > { %p2620_p6 = scmp.eq.s32.totalorder %s3089_s23, 0 }
  0x50   : > { %533 = sbr.rel (%p2620_p6) target bundleno = 678 (0x2a6), region = 52 }
  0x55   : > { %v2819_v1 = vld [vmem:[%s3109_s0 + $0x74] ss:$8 sps:$4 sm:$0xff]   ;;  %v2821_v2 = vld [vmem:[%s3109_s0 + $0x70] ss:$8 sps:$4 sm:$0xff]   ;;  %v2822_v3 = vld [vmem:[%s3109_s0 + $0x64] ss:$8 sps:$4 sm:$0xff]  }
  0x56   : > { %930 = vmatprep.subr.bf16.mxu0 %v2819_v1  ;;  %v2824_v4 = vld [vmem:[%s3109_s0 + $0x60] ss:$8 sps:$4 sm:$0xff]   ;;  %v2825_v5 = vld [vmem:[%s3109_s0 + $0x54] ss:$8 sps:$4 sm:$0xff]   ;;  %v2827_v6 = vld [vmem:[%s3109_s0 + $0x50] ss:$8 sps:$4 sm:$0xff]  }
  0x57   : > { %931 = vmatpush1.bf16.msra.mxu0 %v2821_v2  ;;  %v2828_v7 = vld [vmem:[%s3109_s0 + $0x44] ss:$8 sps:$4 sm:$0xff]   ;;  %v2830_v8 = vld [vmem:[%s3109_s0 + $0x40] ss:$8 sps:$4 sm:$0xff]   ;;  %v2831_v9 = vld [vmem:[%s3109_s0 + $0x34] ss:$8 sps:$4 sm:$0xff]  }
  0x58   : > { %932 = vmatprep.subr.bf16.mxu0 %v2822_v3  ;;  %v2833_v10 = vld [vmem:[%s3109_s0 + $0x30] ss:$8 sps:$4 sm:$0xff]   ;;  %v2834_v11 = vld [vmem:[%s3109_s0 + $0x24] ss:$8 sps:$4 sm:$0xff]   ;;  %v2836_v12 = vld [vmem:[%s3109_s0 + $0x20] ss:$8 sps:$4 sm:$0xff]  }
  0x59   : > { %v2837_v13 = vld [vmem:[%s3109_s0 + $0x14] ss:$8 sps:$4 sm:$0xff]   ;;  %v2869_v14 = vld [vmem:[%s3094_s26 + $0x4] ss:$8 sps:$4 sm:$0xff]   ;;  %v2839_v15 = vld [vmem:[%s3109_s0 + $0x10] ss:$8 sps:$4 sm:$0xff]  }
  0x5a   : > { %v2840_v16 = vld [vmem:[%s3109_s0 + $0x4] ss:$8 sps:$4 sm:$0xff]   ;;  %962 = vmatprep.mubr.bf16.mxu0 %v2869_v14  ;;  %v2842_v17 = vld [vmem:[%s3109_s0] ss:$8 sps:$4 sm:$0xff]   ;;  %v2843_v18 = vld [vmem:[%s3109_s0 + $0xf4] ss:$8 sps:$4 sm:$0xff]  }
  0x5b   : > { %933 = vmatpush1.bf16.msra.mxu0 %v2824_v4  ;;  %v2845_v19 = vld [vmem:[%s3109_s0 + $0xf0] ss:$8 sps:$4 sm:$0xff]   ;;  %v2846_v20 = vld [vmem:[%s3109_s0 + $0xe4] ss:$8 sps:$4 sm:$0xff]   ;;  %v2848_v21 = vld [vmem:[%s3109_s0 + $0xe0] ss:$8 sps:$4 sm:$0xff]  }
  0x5c   : > { %934 = vmatprep.subr.bf16.mxu0 %v2825_v5  ;;  %v2849_v22 = vld [vmem:[%s3109_s0 + $0xd4] ss:$8 sps:$4 sm:$0xff]   ;;  %v2851_v23 = vld [vmem:[%s3109_s0 + $0xd0] ss:$8 sps:$4 sm:$0xff]   ;;  %v2852_v24 = vld [vmem:[%s3109_s0 + $0xc4] ss:$8 sps:$4 sm:$0xff]  }
  0x5d   : > { %v2854_v25 = vld [vmem:[%s3109_s0 + $0xc0] ss:$8 sps:$4 sm:$0xff]   ;;  %v2855_v26 = vld [vmem:[%s3109_s0 + $0xb4] ss:$8 sps:$4 sm:$0xff]   ;;  %v2857_v27 = vld [vmem:[%s3109_s0 + $0xb0] ss:$8 sps:$4 sm:$0xff]  }
  0x5e   : > { %v2858_v28 = vld [vmem:[%s3109_s0 + $0xa4] ss:$8 sps:$4 sm:$0xff]   ;;  %v2860_v29 = vld [vmem:[%s3109_s0 + $0xa0] ss:$8 sps:$4 sm:$0xff]   ;;  %v2861_v30 = vld [vmem:[%s3109_s0 + $0x94] ss:$8 sps:$4 sm:$0xff]  }
  0x5f   : > { %935 = vmatpush1.bf16.msra.mxu0 %v2827_v6  ;;  %v2863_v31 = vld [vmem:[%s3109_s0 + $0x90] ss:$8 sps:$4 sm:$0xff]   ;;  %v2864_v32 = vld [vmem:[%s3109_s0 + $0x84] ss:$8 sps:$4 sm:$0xff]   ;;  %v2915_v33 = vld [vmem:[%s3120_s18 + $0x74] ss:$8 sps:$4 sm:$0xff]  }
  0x60   : > { %936 = vmatprep.subr.bf16.mxu0 %v2828_v7  ;;  %v2917_v34 = vld [vmem:[%s3120_s18 + $0x70] ss:$8 sps:$4 sm:$0xff]   ;;  %v2918_v35 = vld [vmem:[%s3120_s18 + $0x64] ss:$8 sps:$4 sm:$0xff]   ;;  %v2866_v36 = vld [vmem:[%s3109_s0 + $0x80] ss:$8 sps:$4 sm:$0xff]   ;;  %1475 = vmatprep.subr.bf16.mxu1 %v2915_v33  ;;  %v600_v33 = vlaneseq }
  0x61   : > { %1476 = vmatpush1.bf16.msra.mxu1 %v2917_v34  ;;  %v2920_v37 = vld [vmem:[%s3120_s18 + $0x60] ss:$8 sps:$4 sm:$0xff]   ;;  %v2921_v39 = vld [vmem:[%s3120_s18 + $0x54] ss:$8 sps:$4 sm:$0xff]   ;;  %v2923_v41 = vld [vmem:[%s3120_s18 + $0x50] ss:$8 sps:$4 sm:$0xff]  }
  0x62   : > { %v2867_v38 = vld [vmem:[%s3094_s26] ss:$8 sps:$4 sm:$0xff]   ;;  %1477 = vmatprep.subr.bf16.mxu1 %v2918_v35  ;;  %v2870_v40 = vld [vmem:[%s3094_s26 + $0x14] ss:$8 sps:$4 sm:$0xff]   ;;  %v2924_v42 = vld [vmem:[%s3120_s18 + $0x44] ss:$8 sps:$4 sm:$0xff]  }
  0x63   : > { %937 = vmatpush1.bf16.msra.mxu0 %v2830_v8  ;;  %v2926_v43 = vld [vmem:[%s3120_s18 + $0x40] ss:$8 sps:$4 sm:$0xff]   ;;  %v2872_v44 = vld [vmem:[%s3094_s26 + $0x10] ss:$8 sps:$4 sm:$0xff]   ;;  %v2927_v45 = vld [vmem:[%s3120_s18 + $0x34] ss:$8 sps:$4 sm:$0xff]  }
  0x64   : > { %938 = vmatprep.subr.bf16.mxu0 %v2831_v9  ;;  %v2873_v46 = vld [vmem:[%s3094_s26 + $0x24] ss:$8 sps:$4 sm:$0xff]   ;;  %v2929_v47 = vld [vmem:[%s3120_s18 + $0x30] ss:$8 sps:$4 sm:$0xff]   ;;  %v2932_v49 = vld [vmem:[%s3120_s18 + $0x20] ss:$8 sps:$4 sm:$0xff]  }
  0x65   : > { %1478 = vmatpush1.bf16.msra.mxu1 %v2920_v37  ;;  %v2930_v48 = vld [vmem:[%s3120_s18 + $0x24] ss:$8 sps:$4 sm:$0xff]   ;;  %v2875_v50 = vld [vmem:[%s3094_s26 + $0x20] ss:$8 sps:$4 sm:$0xff]   ;;  %v2933_v51 = vld [vmem:[%s3120_s18 + $0x14] ss:$8 sps:$4 sm:$0xff]  }
  0x66   : > { %1479 = vmatprep.subr.bf16.mxu1 %v2921_v39  ;;  %v2876_v52 = vld [vmem:[%s3094_s26 + $0x34] ss:$8 sps:$4 sm:$0xff]   ;;  %v2935_v53 = vld [vmem:[%s3120_s18 + $0x10] ss:$8 sps:$4 sm:$0xff]   ;;  %v2936_v54 = vld [vmem:[%s3120_s18 + $0x4] ss:$8 sps:$4 sm:$0xff]  }
  0x67   : > { %939 = vmatpush1.bf16.msra.mxu0 %v2833_v10  ;;  %v2938_v55 = vld [vmem:[%s3120_s18] ss:$8 sps:$4 sm:$0xff]   ;;  %v2878_v56 = vld [vmem:[%s3094_s26 + $0x30] ss:$8 sps:$4 sm:$0xff]   ;;  %v2939_v57 = vld [vmem:[%s3120_s18 + $0xf4] ss:$8 sps:$4 sm:$0xff]  }
  0x68   : > { %940 = vmatprep.subr.bf16.mxu0 %v2834_v11  ;;  %v2879_v58 = vld [vmem:[%s3094_s26 + $0x44] ss:$8 sps:$4 sm:$0xff]   ;;  %v2941_v59 = vld [vmem:[%s3120_s18 + $0xf0] ss:$8 sps:$4 sm:$0xff]   ;;  %v2944_v61 = vld [vmem:[%s3120_s18 + $0xe0] ss:$8 sps:$4 sm:$0xff]  }
  0x69   : > { %1480 = vmatpush1.bf16.msra.mxu1 %v2923_v41  ;;  %v2942_v60 = vld [vmem:[%s3120_s18 + $0xe4] ss:$8 sps:$4 sm:$0xff]   ;;  %v2881_v62 = vld [vmem:[%s3094_s26 + $0x40] ss:$8 sps:$4 sm:$0xff]   ;;  %v2945_v63 = vld [vmem:[%s3120_s18 + $0xd4] ss:$8 sps:$4 sm:$0xff]  }
  0x6a   : > { %1481 = vmatprep.subr.bf16.mxu1 %v2924_v42  ;;  %v2882_v0 = vld [vmem:[%s3094_s26 + $0x54] ss:$8 sps:$4 sm:$0xff]   ;;  %v2947_v1 = vld [vmem:[%s3120_s18 + $0xd0] ss:$8 sps:$4 sm:$0xff]   ;;  %v2948_v2 = vld [vmem:[%s3120_s18 + $0xc4] ss:$8 sps:$4 sm:$0xff]  }
  0x6b   : > { %941 = vmatpush1.bf16.msra.mxu0 %v2836_v12  ;;  %v2950_v3 = vld [vmem:[%s3120_s18 + $0xc0] ss:$8 sps:$4 sm:$0xff]   ;;  %v2884_v4 = vld [vmem:[%s3094_s26 + $0x50] ss:$8 sps:$4 sm:$0xff]   ;;  %v2951_v5 = vld [vmem:[%s3120_s18 + $0xb4] ss:$8 sps:$4 sm:$0xff]  }
  0x6c   : > { %942 = vmatprep.subr.bf16.mxu0 %v2837_v13  ;;  %v2885_v6 = vld [vmem:[%s3094_s26 + $0x64] ss:$8 sps:$4 sm:$0xff]   ;;  %v2953_v7 = vld [vmem:[%s3120_s18 + $0xb0] ss:$8 sps:$4 sm:$0xff]   ;;  %v2887_v8 = vld [vmem:[%s3094_s26 + $0x60] ss:$8 sps:$4 sm:$0xff]  }
  0x6d   : > { %1482 = vmatpush1.bf16.msra.mxu1 %v2926_v43  ;;  %v2888_v9 = vld [vmem:[%s3094_s26 + $0x74] ss:$8 sps:$4 sm:$0xff]   ;;  %v2890_v10 = vld [vmem:[%s3094_s26 + $0x70] ss:$8 sps:$4 sm:$0xff]   ;;  %v2891_v11 = vld [vmem:[%s3094_s26 + $0x84] ss:$8 sps:$4 sm:$0xff]  }
  0x6e   : > { %1483 = vmatprep.subr.bf16.mxu1 %v2927_v45  ;;  %v2893_v12 = vld [vmem:[%s3094_s26 + $0x80] ss:$8 sps:$4 sm:$0xff]   ;;  %v2894_v13 = vld [vmem:[%s3094_s26 + $0x94] ss:$8 sps:$4 sm:$0xff]   ;;  %v2954_v14 = vld [vmem:[%s3120_s18 + $0xa4] ss:$8 sps:$4 sm:$0xff]  }
  0x6f   : > { %943 = vmatpush1.bf16.msra.mxu0 %v2839_v15  ;;  %v2956_v15 = vld [vmem:[%s3120_s18 + $0xa0] ss:$8 sps:$4 sm:$0xff]   ;;  %v601_v34 = vshrl.u32 %v600_v33, 7 }
  0x70   : > { %944 = vmatprep.subr.bf16.mxu0 %v2840_v16  ;;  %v2896_v16 = vld [vmem:[%s3094_s26 + $0x90] ss:$8 sps:$4 sm:$0xff]   ;;  %v598_v37 = vld [vmem:[%s3114_s25] sm:$0x3] }
  0x71   : > { %1484 = vmatpush1.bf16.msra.mxu1 %v2929_v47  ;;  %v606_v35 = vsub.s32 1, %v601_v34 }
  0x72   : > { %1485 = vmatprep.subr.bf16.mxu1 %v2930_v48 }
  0x73   : > { %945 = vmatpush1.bf16.msra.mxu0 %v2842_v17  ;;  %v2957_v17 = vld [vmem:[%s3120_s18 + $0x94] ss:$8 sps:$4 sm:$0xff]   ;;  %v3293_v39 = vrot.slane %v598_v37, %v606_v35 }
  0x74   : > { %946 = vmatprep.subr.bf16.mxu0 %v2843_v18  ;;  %v2897_v18 = vld [vmem:[%s3094_s26 + $0xa4] ss:$8 sps:$4 sm:$0xff]  }
  0x75   : > { %1486 = vmatpush1.bf16.msra.mxu1 %v2932_v49 }
  0x76   : > { %1487 = vmatprep.subr.bf16.mxu1 %v2933_v51 }
  0x77   : > { %947 = vmatpush2.bf16.msra.mxu0 %v2845_v19  ;;  %v2959_v19 = vld [vmem:[%s3120_s18 + $0x90] ss:$8 sps:$4 sm:$0xff]  }
  0x78   : > { %948 = vmatprep.subr.bf16.mxu0 %v2846_v20  ;;  %v2960_v20 = vld [vmem:[%s3120_s18 + $0x84] ss:$8 sps:$4 sm:$0xff]  }
  0x79   : > { %1488 = vmatpush1.bf16.msra.mxu1 %v2935_v53 }
  0x7a   : > { %1489 = vmatprep.subr.bf16.mxu1 %v2936_v54 }
  0x7b   : > { %949 = vmatpush2.bf16.msra.mxu0 %v2848_v21  ;;  %v2962_v21 = vld [vmem:[%s3120_s18 + $0x80] ss:$8 sps:$4 sm:$0xff]  }
  0x7c   : > { %950 = vmatprep.subr.bf16.mxu0 %v2849_v22  ;;  %v2899_v22 = vld [vmem:[%s3094_s26 + $0xa0] ss:$8 sps:$4 sm:$0xff]  }
  0x7d   : > { %1490 = vmatpush1.bf16.msra.mxu1 %v2938_v55 }
  0x7e   : > { %1491 = vmatprep.subr.bf16.mxu1 %v2939_v57 }
  0x7f   : > { %951 = vmatpush2.bf16.msra.mxu0 %v2851_v23  ;;  %v2900_v23 = vld [vmem:[%s3094_s26 + $0xb4] ss:$8 sps:$4 sm:$0xff]  }
  0x80   : > { %952 = vmatprep.subr.bf16.mxu0 %v2852_v24  ;;  %v2902_v24 = vld [vmem:[%s3094_s26 + $0xb0] ss:$8 sps:$4 sm:$0xff]  }
  0x81   : > { %1492 = vmatpush2.bf16.msra.mxu1 %v2941_v59 }
  0x82   : > { %1493 = vmatprep.subr.bf16.mxu1 %v2942_v60 }
  0x83   : > { %953 = vmatpush2.bf16.msra.mxu0 %v2854_v25  ;;  %v2903_v25 = vld [vmem:[%s3094_s26 + $0xc4] ss:$8 sps:$4 sm:$0xff]  }
  0x84   : > { %954 = vmatprep.subr.bf16.mxu0 %v2855_v26  ;;  %v2905_v26 = vld [vmem:[%s3094_s26 + $0xc0] ss:$8 sps:$4 sm:$0xff]  }
  0x85   : > { %1494 = vmatpush2.bf16.msra.mxu1 %v2944_v61 }
  0x86   : > { %1495 = vmatprep.subr.bf16.mxu1 %v2945_v63 }
  0x87   : > { %955 = vmatpush2.bf16.msra.mxu0 %v2857_v27  ;;  %v2906_v27 = vld [vmem:[%s3094_s26 + $0xd4] ss:$8 sps:$4 sm:$0xff]  }
  0x88   : > { %956 = vmatprep.subr.bf16.mxu0 %v2858_v28  ;;  %v2908_v28 = vld [vmem:[%s3094_s26 + $0xd0] ss:$8 sps:$4 sm:$0xff]  }
  0x89   : > { %1496 = vmatpush2.bf16.msra.mxu1 %v2947_v1 }
  0x8a   : > { %1497 = vmatprep.subr.bf16.mxu1 %v2948_v2 }
  0x8b   : > { %957 = vmatpush2.bf16.msra.mxu0 %v2860_v29  ;;  %v2909_v29 = vld [vmem:[%s3094_s26 + $0xe4] ss:$8 sps:$4 sm:$0xff]  }
  0x8c   : > { %958 = vmatprep.subr.bf16.mxu0 %v2861_v30  ;;  %v2911_v30 = vld [vmem:[%s3094_s26 + $0xe0] ss:$8 sps:$4 sm:$0xff]  }
  0x8d   : > { %1498 = vmatpush2.bf16.msra.mxu1 %v2950_v3 }
  0x8e   : > { %1499 = vmatprep.subr.bf16.mxu1 %v2951_v5 }
  0x8f   : > { %959 = vmatpush2.bf16.msra.mxu0 %v2863_v31  ;;  %v2912_v31 = vld [vmem:[%s3094_s26 + $0xf4] ss:$8 sps:$4 sm:$0xff]  }
  0x90   : > { %960 = vmatprep.subr.bf16.mxu0 %v2864_v32  ;;  %v2914_v32 = vld [vmem:[%s3094_s26 + $0xf0] ss:$8 sps:$4 sm:$0xff]  }
  0x91   : > { %1500 = vmatpush2.bf16.msra.mxu1 %v2953_v7 }
  0x92   : > { %1501 = vmatprep.subr.bf16.mxu1 %v2954_v14 }
  0x93   : > { %961 = vmatpush2.bf16.msra.mxu0 %v2866_v36  ;;  %v602_v36 = vsub.s32 0, %v601_v34 }
  0x95   : > { %1502 = vmatpush2.bf16.msra.mxu1 %v2956_v15 }
  0x96   : > { %963 = vmatmul.mubr.bf16.vlgmr.msra.gmra.mxu0 %v2867_v38  ;;  %1503 = vmatprep.subr.bf16.mxu1 %v2957_v17 }
  0x97   : > { %972 = vmatprep.mubr.bf16.mxu0 %v2870_v40  ;;  %v3295_v40 = vrot.slane %v598_v37, %v602_v36 }
  0x99   : > { %1504 = vmatpush2.bf16.msra.mxu1 %v2959_v19 }
  0x9a   : > { %1505 = vmatprep.subr.bf16.mxu1 %v2960_v20 }
  0x9d   : > { %1506 = vmatpush2.bf16.msra.mxu1 %v2962_v21 }
  0x9e   : > { %973 = vmatmul.mubr.bf16.gmra.mxu0 %v2872_v44 }
  0x9f   : > { %982 = vmatprep.mubr.bf16.mxu0 %v2873_v46 }
  0xa6   : > { %983 = vmatmul.mubr.bf16.gmra.mxu0 %v2875_v50 }
  0xa7   : > { %992 = vmatprep.mubr.bf16.mxu0 %v2876_v52 }
  0xae   : > { %993 = vmatmul.mubr.bf16.gmra.mxu0 %v2878_v56 }
  0xaf   : > { %1002 = vmatprep.mubr.bf16.mxu0 %v2879_v58 }
  0xb6   : > { %1003 = vmatmul.mubr.bf16.gmra.mxu0 %v2881_v62 }
  0xb7   : > { %1012 = vmatprep.mubr.bf16.mxu0 %v2882_v0 }
  0xbe   : > { %1013 = vmatmul.mubr.bf16.gmra.mxu0 %v2884_v4 }
  0xbf   : > { %1022 = vmatprep.mubr.bf16.mxu0 %v2885_v6 }
  0xc6   : > { %1023 = vmatmul.mubr.bf16.gmra.mxu0 %v2887_v8 }
  0xc7   : > { %1032 = vmatprep.mubr.bf16.mxu0 %v2888_v9 }
  0xce   : > { %1033 = vmatmul.mubr.bf16.gmra.mxu0 %v2890_v10 }
  0xcf   : > { %1042 = vmatprep.mubr.bf16.mxu0 %v2891_v11 }
  0xd6   : > { %1043 = vmatmul.mubr.bf16.gmra.mxu0 %v2893_v12 }
  0xd7   : > { %1052 = vmatprep.mubr.bf16.mxu0 %v2894_v13 }
  0xde   : > { %1053 = vmatmul.mubr.bf16.gmra.mxu0 %v2896_v16 }
  0xdf   : > { %1062 = vmatprep.mubr.bf16.mxu0 %v2897_v18 }
  0xe6   : > { %1063 = vmatmul.mubr.bf16.gmra.mxu0 %v2899_v22 }
  0xe7   : > { %1072 = vmatprep.mubr.bf16.mxu0 %v2900_v23 }
  0xee   : > { %1073 = vmatmul.mubr.bf16.gmra.mxu0 %v2902_v24 }
  0xef   : > { %1082 = vmatprep.mubr.bf16.mxu0 %v2903_v25 }
  0xf6   : > { %1083 = vmatmul.mubr.bf16.gmra.mxu0 %v2905_v26 }
  0xf7   : > { %1092 = vmatprep.mubr.bf16.mxu0 %v2906_v27 }
  0xfe   : > { %1093 = vmatmul.mubr.bf16.gmra.mxu0 %v2908_v28 }
  0xff   : > { %1102 = vmatprep.mubr.bf16.mxu0 %v2909_v29 }
 0x106   : > { %1103 = vmatmul.mubr.bf16.gmra.mxu0 %v2911_v30 }
 0x107   : > { %1112 = vmatprep.mubr.bf16.mxu0 %v2912_v31 }
 0x10e   : > { %1113 = vmatmul.mubr.bf16.gmra.mxu0 %v2914_v32 }
 0x156   : > { %v964_v38 = vpop.f32.mrf.mxu0 }
 0x157   : > { %v965_v45 = vadd.f32 %v964_v38, %v3295_v40 }
 0x158   : > { %v966_v41 = vpop.f32.mrf.mxu0 }
 0x159   : > { %v967_v43 = vadd.f32 %v966_v41, %v3293_v39  ;;  %v1123_v52 = vmax.f32 %v965_v45, 0.0 }
 0x15a   : > { %v968_v42 = vpop.f32.mrf.mxu0 }
 0x15b   : > { %v969_v44 = vadd.f32 %v968_v42, %v3295_v40  ;;  %v1124_v50 = vmax.f32 %v967_v43, 0.0 }
 0x15c   : > { %v970_v46 = vpop.f32.mrf.mxu0 }
 0x15d   : > { %v971_v47 = vadd.f32 %v970_v46, %v3293_v39  ;;  %v1125_v48 = vmax.f32 %v969_v44, 0.0 }
 0x15e   : > { %v974_v49 = vpop.f32.mrf.mxu0 }
 0x15f   : > { %v1126_v51 = vmax.f32 %v971_v47, 0.0  ;;  %v1251_v55 = vpack.c.bf16 %v1125_v48, %v1123_v52  ;;  %v975_v59 = vadd.f32 %v974_v49, %v3295_v40 }
 0x160   : > { %v976_v53 = vpop.f32.mrf.mxu0 }
 0x161   : > { %v1252_v54 = vpack.c.bf16 %v1126_v51, %v1124_v50  ;;  %v977_v57 = vadd.f32 %v976_v53, %v3293_v39  ;;  %v1127_v2 = vmax.f32 %v975_v59, 0.0 }
 0x162   : > { %v978_v56 = vpop.f32.mrf.mxu0 }
 0x163   : > { %v979_v58 = vadd.f32 %v978_v56, %v3295_v40  ;;  %1507 = vmatprep.mubr.bf16.mxu1 %v1252_v54  ;;  %v1128_v0 = vmax.f32 %v977_v57, 0.0 }
 0x164   : > { %v980_v60 = vpop.f32.mrf.mxu0  ;;  %1508 = vmatmul.mubr.bf16.vlgmr.msra.gmra.mxu1 %v1251_v55 }
 0x165   : > { %v981_v61 = vadd.f32 %v980_v60, %v3293_v39  ;;  %v1129_v62 = vmax.f32 %v979_v58, 0.0 }
 0x166   : > { %v984_v63 = vpop.f32.mrf.mxu0 }
 0x167   : > { %v1130_v1 = vmax.f32 %v981_v61, 0.0  ;;  %v1253_v5 = vpack.c.bf16 %v1129_v62, %v1127_v2  ;;  %v985_v9 = vadd.f32 %v984_v63, %v3295_v40 }
 0x168   : > { %v986_v3 = vpop.f32.mrf.mxu0 }
 0x169   : > { %v1254_v4 = vpack.c.bf16 %v1130_v1, %v1128_v0  ;;  %v987_v7 = vadd.f32 %v986_v3, %v3293_v39  ;;  %v1131_v16 = vmax.f32 %v985_v9, 0.0 }
 0x16a   : > { %v988_v6 = vpop.f32.mrf.mxu0 }
 0x16b   : > { %v989_v8 = vadd.f32 %v988_v6, %v3295_v40  ;;  %1517 = vmatprep.mubr.bf16.mxu1 %v1254_v4  ;;  %v1132_v14 = vmax.f32 %v987_v7, 0.0 }
 0x16c   : > { %v990_v10 = vpop.f32.mrf.mxu0  ;;  %1518 = vmatmul.mubr.bf16.gmra.mxu1 %v1253_v5 }
 0x16d   : > { %v991_v11 = vadd.f32 %v990_v10, %v3293_v39  ;;  %v1133_v12 = vmax.f32 %v989_v8, 0.0 }
 0x16e   : > { %v994_v13 = vpop.f32.mrf.mxu0 }
 0x16f   : > { %v1134_v15 = vmax.f32 %v991_v11, 0.0  ;;  %v1255_v19 = vpack.c.bf16 %v1133_v12, %v1131_v16  ;;  %v995_v23 = vadd.f32 %v994_v13, %v3295_v40 }
 0x170   : > { %v996_v17 = vpop.f32.mrf.mxu0 }
 0x171   : > { %v1256_v18 = vpack.c.bf16 %v1134_v15, %v1132_v14  ;;  %v997_v21 = vadd.f32 %v996_v17, %v3293_v39  ;;  %v1135_v30 = vmax.f32 %v995_v23, 0.0 }
 0x172   : > { %v998_v20 = vpop.f32.mrf.mxu0 }
 0x173   : > { %v999_v22 = vadd.f32 %v998_v20, %v3295_v40  ;;  %1527 = vmatprep.mubr.bf16.mxu1 %v1256_v18  ;;  %v1136_v28 = vmax.f32 %v997_v21, 0.0 }
 0x174   : > { %v1000_v24 = vpop.f32.mrf.mxu0  ;;  %1528 = vmatmul.mubr.bf16.gmra.mxu1 %v1255_v19 }
 0x175   : > { %v1001_v25 = vadd.f32 %v1000_v24, %v3293_v39  ;;  %v1137_v26 = vmax.f32 %v999_v22, 0.0 }
 0x176   : > { %v1004_v27 = vpop.f32.mrf.mxu0 }
 0x177   : > { %v1138_v29 = vmax.f32 %v1001_v25, 0.0  ;;  %v1257_v33 = vpack.c.bf16 %v1137_v26, %v1135_v30  ;;  %v1005_v37 = vadd.f32 %v1004_v27, %v3295_v40 }
 0x178   : > { %v1006_v31 = vpop.f32.mrf.mxu0 }
 0x179   : > { %v1258_v32 = vpack.c.bf16 %v1138_v29, %v1136_v28  ;;  %v1007_v35 = vadd.f32 %v1006_v31, %v3293_v39  ;;  %v1139_v46 = vmax.f32 %v1005_v37, 0.0 }
 0x17a   : > { %v1008_v34 = vpop.f32.mrf.mxu0 }
 0x17b   : > { %v1009_v36 = vadd.f32 %v1008_v34, %v3295_v40  ;;  %1537 = vmatprep.mubr.bf16.mxu1 %v1258_v32  ;;  %v1140_v44 = vmax.f32 %v1007_v35, 0.0 }
 0x17c   : > { %v1010_v38 = vpop.f32.mrf.mxu0  ;;  %1538 = vmatmul.mubr.bf16.gmra.mxu1 %v1257_v33 }
 0x17d   : > { %v1011_v41 = vadd.f32 %v1010_v38, %v3293_v39  ;;  %v1141_v42 = vmax.f32 %v1009_v36, 0.0 }
 0x17e   : > { %v1014_v43 = vpop.f32.mrf.mxu0 }
 0x17f   : > { %v1142_v45 = vmax.f32 %v1011_v41, 0.0  ;;  %v1259_v49 = vpack.c.bf16 %v1141_v42, %v1139_v46  ;;  %v1015_v53 = vadd.f32 %v1014_v43, %v3295_v40 }
 0x180   : > { %v1016_v47 = vpop.f32.mrf.mxu0 }
 0x181   : > { %v1260_v48 = vpack.c.bf16 %v1142_v45, %v1140_v44  ;;  %v1017_v51 = vadd.f32 %v1016_v47, %v3293_v39  ;;  %v1143_v60 = vmax.f32 %v1015_v53, 0.0 }
 0x182   : > { %v1018_v50 = vpop.f32.mrf.mxu0 }
 0x183   : > { %v1019_v52 = vadd.f32 %v1018_v50, %v3295_v40  ;;  %1547 = vmatprep.mubr.bf16.mxu1 %v1260_v48  ;;  %v1144_v58 = vmax.f32 %v1017_v51, 0.0 }
 0x184   : > { %v1020_v54 = vpop.f32.mrf.mxu0  ;;  %1548 = vmatmul.mubr.bf16.gmra.mxu1 %v1259_v49 }
 0x185   : > { %v1021_v55 = vadd.f32 %v1020_v54, %v3293_v39  ;;  %v1145_v56 = vmax.f32 %v1019_v52, 0.0 }
 0x186   : > { %v1024_v57 = vpop.f32.mrf.mxu0 }
 0x187   : > { %v1146_v59 = vmax.f32 %v1021_v55, 0.0  ;;  %v1261_v63 = vpack.c.bf16 %v1145_v56, %v1143_v60  ;;  %v1025_v3 = vadd.f32 %v1024_v57, %v3295_v40 }
 0x188   : > { %v1026_v61 = vpop.f32.mrf.mxu0 }
 0x189   : > { %v1262_v62 = vpack.c.bf16 %v1146_v59, %v1144_v58  ;;  %v1027_v1 = vadd.f32 %v1026_v61, %v3293_v39  ;;  %v1147_v10 = vmax.f32 %v1025_v3, 0.0 }
 0x18a   : > { %v1028_v0 = vpop.f32.mrf.mxu0 }
 0x18b   : > { %v1029_v2 = vadd.f32 %v1028_v0, %v3295_v40  ;;  %1557 = vmatprep.mubr.bf16.mxu1 %v1262_v62  ;;  %v1148_v8 = vmax.f32 %v1027_v1, 0.0 }
 0x18c   : > { %v1030_v4 = vpop.f32.mrf.mxu0  ;;  %1558 = vmatmul.mubr.bf16.gmra.mxu1 %v1261_v63 }
 0x18d   : > { %v1031_v5 = vadd.f32 %v1030_v4, %v3293_v39  ;;  %v1149_v6 = vmax.f32 %v1029_v2, 0.0 }
 0x18e   : > { %v1034_v7 = vpop.f32.mrf.mxu0 }
 0x18f   : > { %v1150_v9 = vmax.f32 %v1031_v5, 0.0  ;;  %v1263_v13 = vpack.c.bf16 %v1149_v6, %v1147_v10  ;;  %v1035_v17 = vadd.f32 %v1034_v7, %v3295_v40 }
 0x190   : > { %v1036_v11 = vpop.f32.mrf.mxu0 }
 0x191   : > { %v1264_v12 = vpack.c.bf16 %v1150_v9, %v1148_v8  ;;  %v1037_v15 = vadd.f32 %v1036_v11, %v3293_v39  ;;  %v1151_v24 = vmax.f32 %v1035_v17, 0.0 }
 0x192   : > { %v1038_v14 = vpop.f32.mrf.mxu0 }
 0x193   : > { %v1039_v16 = vadd.f32 %v1038_v14, %v3295_v40  ;;  %1567 = vmatprep.mubr.bf16.mxu1 %v1264_v12  ;;  %v1152_v22 = vmax.f32 %v1037_v15, 0.0 }
 0x194   : > { %v1040_v18 = vpop.f32.mrf.mxu0  ;;  %1568 = vmatmul.mubr.bf16.gmra.mxu1 %v1263_v13 }
 0x195   : > { %v1041_v19 = vadd.f32 %v1040_v18, %v3293_v39  ;;  %v1153_v20 = vmax.f32 %v1039_v16, 0.0 }
 0x196   : > { %v1044_v21 = vpop.f32.mrf.mxu0 }
 0x197   : > { %v1154_v23 = vmax.f32 %v1041_v19, 0.0  ;;  %v1265_v27 = vpack.c.bf16 %v1153_v20, %v1151_v24  ;;  %v1045_v31 = vadd.f32 %v1044_v21, %v3295_v40 }
 0x198   : > { %v1046_v25 = vpop.f32.mrf.mxu0 }
 0x199   : > { %v1266_v26 = vpack.c.bf16 %v1154_v23, %v1152_v22  ;;  %v1047_v29 = vadd.f32 %v1046_v25, %v3293_v39  ;;  %v1155_v38 = vmax.f32 %v1045_v31, 0.0 }
 0x19a   : > { %v1048_v28 = vpop.f32.mrf.mxu0 }
 0x19b   : > { %v1049_v30 = vadd.f32 %v1048_v28, %v3295_v40  ;;  %1577 = vmatprep.mubr.bf16.mxu1 %v1266_v26  ;;  %v1156_v36 = vmax.f32 %v1047_v29, 0.0 }
 0x19c   : > { %v1050_v32 = vpop.f32.mrf.mxu0  ;;  %1578 = vmatmul.mubr.bf16.gmra.mxu1 %v1265_v27 }
 0x19d   : > { %v1051_v33 = vadd.f32 %v1050_v32, %v3293_v39  ;;  %v1157_v34 = vmax.f32 %v1049_v30, 0.0 }
 0x19e   : > { %v1054_v35 = vpop.f32.mrf.mxu0 }
 0x19f   : > { %v1158_v37 = vmax.f32 %v1051_v33, 0.0  ;;  %v1267_v43 = vpack.c.bf16 %v1157_v34, %v1155_v38  ;;  %v1055_v47 = vadd.f32 %v1054_v35, %v3295_v40 }
 0x1a0   : > { %v1056_v41 = vpop.f32.mrf.mxu0 }
 0x1a1   : > { %v1268_v42 = vpack.c.bf16 %v1158_v37, %v1156_v36  ;;  %v1057_v45 = vadd.f32 %v1056_v41, %v3293_v39  ;;  %v1159_v54 = vmax.f32 %v1055_v47, 0.0 }
 0x1a2   : > { %v1058_v44 = vpop.f32.mrf.mxu0 }
 0x1a3   : > { %v1059_v46 = vadd.f32 %v1058_v44, %v3295_v40  ;;  %1587 = vmatprep.mubr.bf16.mxu1 %v1268_v42  ;;  %v1160_v52 = vmax.f32 %v1057_v45, 0.0 }
 0x1a4   : > { %v1060_v48 = vpop.f32.mrf.mxu0  ;;  %1588 = vmatmul.mubr.bf16.gmra.mxu1 %v1267_v43 }
 0x1a5   : > { %v1061_v49 = vadd.f32 %v1060_v48, %v3293_v39  ;;  %v1161_v50 = vmax.f32 %v1059_v46, 0.0 }
 0x1a6   : > { %v1064_v51 = vpop.f32.mrf.mxu0 }
 0x1a7   : > { %v1162_v53 = vmax.f32 %v1061_v49, 0.0  ;;  %v1269_v57 = vpack.c.bf16 %v1161_v50, %v1159_v54  ;;  %v1065_v61 = vadd.f32 %v1064_v51, %v3295_v40 }
 0x1a8   : > { %v1066_v55 = vpop.f32.mrf.mxu0 }
 0x1a9   : > { %v1270_v56 = vpack.c.bf16 %v1162_v53, %v1160_v52  ;;  %v1067_v59 = vadd.f32 %v1066_v55, %v3293_v39  ;;  %v1163_v4 = vmax.f32 %v1065_v61, 0.0 }
 0x1aa   : > { %v1068_v58 = vpop.f32.mrf.mxu0 }
 0x1ab   : > { %v1069_v60 = vadd.f32 %v1068_v58, %v3295_v40  ;;  %1597 = vmatprep.mubr.bf16.mxu1 %v1270_v56  ;;  %v1164_v2 = vmax.f32 %v1067_v59, 0.0 }
 0x1ac   : > { %v1070_v62 = vpop.f32.mrf.mxu0  ;;  %1598 = vmatmul.mubr.bf16.gmra.mxu1 %v1269_v57 }
 0x1ad   : > { %v1071_v63 = vadd.f32 %v1070_v62, %v3293_v39  ;;  %v1165_v0 = vmax.f32 %v1069_v60, 0.0 }
 0x1ae   : > { %v1074_v1 = vpop.f32.mrf.mxu0 }
 0x1af   : > { %v1166_v3 = vmax.f32 %v1071_v63, 0.0  ;;  %v1271_v7 = vpack.c.bf16 %v1165_v0, %v1163_v4  ;;  %v1075_v11 = vadd.f32 %v1074_v1, %v3295_v40 }
 0x1b0   : > { %v1076_v5 = vpop.f32.mrf.mxu0 }
 0x1b1   : > { %v1272_v6 = vpack.c.bf16 %v1166_v3, %v1164_v2  ;;  %v1077_v9 = vadd.f32 %v1076_v5, %v3293_v39  ;;  %v1167_v18 = vmax.f32 %v1075_v11, 0.0 }
 0x1b2   : > { %v1078_v8 = vpop.f32.mrf.mxu0 }
 0x1b3   : > { %v1079_v10 = vadd.f32 %v1078_v8, %v3295_v40  ;;  %1607 = vmatprep.mubr.bf16.mxu1 %v1272_v6  ;;  %v1168_v16 = vmax.f32 %v1077_v9, 0.0 }
 0x1b4   : > { %v1080_v12 = vpop.f32.mrf.mxu0  ;;  %1608 = vmatmul.mubr.bf16.gmra.mxu1 %v1271_v7 }
 0x1b5   : > { %v1081_v13 = vadd.f32 %v1080_v12, %v3293_v39  ;;  %v1169_v14 = vmax.f32 %v1079_v10, 0.0 }
 0x1b6   : > { %v1084_v15 = vpop.f32.mrf.mxu0 }
 0x1b7   : > { %v1170_v17 = vmax.f32 %v1081_v13, 0.0  ;;  %v1273_v21 = vpack.c.bf16 %v1169_v14, %v1167_v18  ;;  %v1085_v25 = vadd.f32 %v1084_v15, %v3295_v40  ;;  %v1187_v14 = vld [vmem:[#allocation2 + $0xb0] sm:$0xff] }
 0x1b8   : > { %v1086_v19 = vpop.f32.mrf.mxu0 }
 0x1b9   : > { %v1274_v20 = vpack.c.bf16 %v1170_v17, %v1168_v16  ;;  %v1087_v23 = vadd.f32 %v1086_v19, %v3293_v39  ;;  %v1171_v32 = vmax.f32 %v1085_v25, 0.0  ;;  %v1188_v16 = vld [vmem:[#allocation2 + $0x1b0] sm:$0xff]  ;;  %v1189_v19 = vld [vmem:[#allocation2 + $0xd8] sm:$0xff] }
 0x1ba   : > { %v1088_v22 = vpop.f32.mrf.mxu0 }
 0x1bb   : > { %v1089_v24 = vadd.f32 %v1088_v22, %v3295_v40  ;;  %1617 = vmatprep.mubr.bf16.mxu1 %v1274_v20  ;;  %v1172_v30 = vmax.f32 %v1087_v23, 0.0  ;;  %v1191_v23 = vld [vmem:[#allocation2 + $0x50] sm:$0xff] }
 0x1bc   : > { %v1090_v26 = vpop.f32.mrf.mxu0  ;;  %1618 = vmatmul.mubr.bf16.gmra.mxu1 %v1273_v21  ;;  %v1190_v21 = vld [vmem:[#allocation2 + $0x18] sm:$0xff] }
 0x1bd   : > { %v1091_v27 = vadd.f32 %v1090_v26, %v3293_v39  ;;  %v1173_v28 = vmax.f32 %v1089_v24, 0.0  ;;  %v1192_v26 = vld [vmem:[#allocation2 + $0x168] sm:$0xff] }
 0x1be   : > { %v1094_v29 = vpop.f32.mrf.mxu0 }
 0x1bf   : > { %v1174_v31 = vmax.f32 %v1091_v27, 0.0  ;;  %v1275_v35 = vpack.c.bf16 %v1173_v28, %v1171_v32  ;;  %v1095_v41 = vadd.f32 %v1094_v29, %v3295_v40  ;;  %v1193_v29 = vld [vmem:[#allocation2 + $0x130] sm:$0xff]  ;;  %v1194_v32 = vld [vmem:[#allocation2 + $0x48] sm:$0xff] }
 0x1c0   : > { %v1096_v33 = vpop.f32.mrf.mxu0 }
 0x1c1   : > { %v1276_v34 = vpack.c.bf16 %v1174_v31, %v1172_v30  ;;  %v1097_v37 = vadd.f32 %v1096_v33, %v3293_v39  ;;  %v1175_v48 = vmax.f32 %v1095_v41, 0.0 }
 0x1c2   : > { %v1098_v36 = vpop.f32.mrf.mxu0 }
 0x1c3   : > { %v1099_v38 = vadd.f32 %v1098_v36, %v3295_v40  ;;  %1627 = vmatprep.mubr.bf16.mxu1 %v1276_v34  ;;  %v1176_v46 = vmax.f32 %v1097_v37, 0.0 }
 0x1c4   : > { %v1100_v42 = vpop.f32.mrf.mxu0  ;;  %1628 = vmatmul.mubr.bf16.gmra.mxu1 %v1275_v35  ;;  %v1195_v35 = vld [vmem:[#allocation2 + $0x180] sm:$0xff] }
 0x1c5   : > { %v1101_v43 = vadd.f32 %v1100_v42, %v3293_v39  ;;  %v1177_v44 = vmax.f32 %v1099_v38, 0.0  ;;  %v1196_v38 = vld [vmem:[#allocation2 + $0x110] sm:$0xff] }
 0x1c6   : > { %v1104_v45 = vpop.f32.mrf.mxu0 }
 0x1c7   : > { %v1178_v47 = vmax.f32 %v1101_v43, 0.0  ;;  %v1277_v51 = vpack.c.bf16 %v1177_v44, %v1175_v48  ;;  %v1105_v55 = vadd.f32 %v1104_v45, %v3295_v40  ;;  %v1197_v43 = vld [vmem:[#allocation2 + $0x118] sm:$0xff] }
 0x1c8   : > { %v1106_v49 = vpop.f32.mrf.mxu0 }
 0x1c9   : > { %v1278_v50 = vpack.c.bf16 %v1178_v47, %v1176_v46  ;;  %v1107_v53 = vadd.f32 %v1106_v49, %v3293_v39  ;;  %v1179_v62 = vmax.f32 %v1105_v55, 0.0  ;;  %v1198_v46 = vld [vmem:[#allocation2 + $0x98] sm:$0xff]  ;;  %v1199_v49 = vld [vmem:[#allocation2 + $0x120] sm:$0xff]  ;;  %v1201_v55 = vld [vmem:[#allocation2 + $0x108] sm:$0xff] }
 0x1ca   : > { %v1108_v52 = vpop.f32.mrf.mxu0 }
 0x1cb   : > { %v1109_v54 = vadd.f32 %v1108_v52, %v3295_v40  ;;  %1637 = vmatprep.mubr.bf16.mxu1 %v1278_v50  ;;  %v1180_v60 = vmax.f32 %v1107_v53, 0.0  ;;  %v1200_v52 = vld [vmem:[#allocation2 + $0x150] sm:$0xff] }
 0x1cc   : > { %v1110_v56 = vpop.f32.mrf.mxu0  ;;  %1638 = vmatmul.mubr.bf16.gmra.mxu1 %v1277_v51 }
 0x1cd   : > { %v1111_v57 = vadd.f32 %v1110_v56, %v3293_v39  ;;  %v1181_v58 = vmax.f32 %v1109_v54, 0.0 }
 0x1ce   : > { %v1114_v59 = vpop.f32.mrf.mxu0 }
 0x1cf   : > { %v1182_v61 = vmax.f32 %v1111_v57, 0.0  ;;  %v1279_v1 = vpack.c.bf16 %v1181_v58, %v1179_v62  ;;  %v1115_v5 = vadd.f32 %v1114_v59, %v3295_v40  ;;  %v1202_v58 = vld [vmem:[#allocation2 + $0x60] sm:$0xff] }
 0x1d0   : > { %v1116_v63 = vpop.f32.mrf.mxu0 }
 0x1d1   : > { %v1280_v0 = vpack.c.bf16 %v1182_v61, %v1180_v60  ;;  %v1117_v3 = vadd.f32 %v1116_v63, %v3293_v39  ;;  %v1183_v11 = vmax.f32 %v1115_v5, 0.0  ;;  %v1203_v61 = vld [vmem:[#allocation2 + $0xe0] sm:$0xff] }
 0x1d2   : > { %v1118_v2 = vpop.f32.mrf.mxu0 }
 0x1d3   : > { %v1119_v4 = vadd.f32 %v1118_v2, %v3295_v40  ;;  %1647 = vmatprep.mubr.bf16.mxu1 %v1280_v0  ;;  %v1184_v9 = vmax.f32 %v1117_v3, 0.0  ;;  %v1204_v0 = vld [vmem:[#allocation2 + $0x188] sm:$0xff]  ;;  %v1205_v3 = vld [vmem:[#allocation2 + $0x138] sm:$0xff] }
 0x1d4   : > { %v1120_v6 = vpop.f32.mrf.mxu0  ;;  %1648 = vmatmul.mubr.bf16.gmra.mxu1 %v1279_v1 }
 0x1d5   : > { %v1121_v7 = vadd.f32 %v1120_v6, %v3293_v39  ;;  %v1185_v8 = vmax.f32 %v1119_v4, 0.0  ;;  %v1206_v6 = vld [vmem:[#allocation2 + $0x140] sm:$0xff] }
 0x1d7   : > { %v1186_v10 = vmax.f32 %v1121_v7, 0.0  ;;  %v1281_v13 = vpack.c.bf16 %v1185_v8, %v1183_v11 }
 0x1d9   : > { %v1282_v12 = vpack.c.bf16 %v1186_v10, %v1184_v9  ;;  %v1207_v9 = vld [vmem:[#allocation2 + $0x80] sm:$0xff] }
 0x1db   : > { %1657 = vmatprep.mubr.bf16.mxu1 %v1282_v12  ;;  %v1208_v12 = vld [vmem:[#allocation2 + $0x1a8] sm:$0xff] }
 0x1dc   : > { %1658 = vmatmul.mubr.bf16.gmra.mxu1 %v1281_v13 }
 0x224   : > { %v1509_v15 = vpop.f32.mrf.mxu1 }
 0x225   : > { %v1668_v17 = vadd.f32 %v1509_v15, %v1187_v14  ;;  %v1209_v15 = vld [vmem:[#allocation2 + $0x1b8] sm:$0xff] }
 0x226   : > { %v1511_v18 = vpop.f32.mrf.mxu1 }
 0x227   : > { %1732 = vst [vmem:[#allocation2 + $0xb0] sm:$0xff] %v1668_v17  ;;  %v1669_v40 = vadd.f32 %v1511_v18, %v1188_v16  ;;  %v1210_v18 = vld [vmem:[#allocation2 + $0x28] sm:$0xff] }
 0x228   : > { %v1513_v20 = vpop.f32.mrf.mxu1 }
 0x229   : > { %1733 = vst [vmem:[#allocation2 + $0x1b0] sm:$0xff] %v1669_v40  ;;  %v1670_v39 = vadd.f32 %v1513_v20, %v1189_v19  ;;  %v1211_v20 = vld [vmem:[#allocation2 + $0x1e8] sm:$0xff] }
 0x22a   : > { %v1515_v22 = vpop.f32.mrf.mxu1 }
 0x22b   : > { %1734 = vst [vmem:[#allocation2 + $0xd8] sm:$0xff] %v1670_v39  ;;  %v1671_v24 = vadd.f32 %v1515_v22, %v1190_v21  ;;  %v1212_v22 = vld [vmem:[#allocation2 + $0xf8] sm:$0xff] }
 0x22c   : > { %v1519_v25 = vpop.f32.mrf.mxu1 }
 0x22d   : > { %1735 = vst [vmem:[#allocation2 + $0x18] sm:$0xff] %v1671_v24  ;;  %v1672_v27 = vadd.f32 %v1519_v25, %v1191_v23  ;;  %v1213_v25 = vld [vmem:[#allocation2 + $0x160] sm:$0xff] }
 0x22e   : > { %v1521_v28 = vpop.f32.mrf.mxu1 }
 0x22f   : > { %1736 = vst [vmem:[#allocation2 + $0x50] sm:$0xff] %v1672_v27  ;;  %v1673_v30 = vadd.f32 %v1521_v28, %v1192_v26  ;;  %v1214_v28 = vld [vmem:[#allocation2 + $0x30] sm:$0xff] }
 0x230   : > { %v1523_v31 = vpop.f32.mrf.mxu1 }
 0x231   : > { %1737 = vst [vmem:[#allocation2 + $0x168] sm:$0xff] %v1673_v30  ;;  %v1674_v33 = vadd.f32 %v1523_v31, %v1193_v29  ;;  %v1215_v31 = vld [vmem:[#allocation2 + $0x1e0] sm:$0xff] }
 0x232   : > { %v1525_v34 = vpop.f32.mrf.mxu1 }
 0x233   : > { %1738 = vst [vmem:[#allocation2 + $0x130] sm:$0xff] %v1674_v33  ;;  %v1675_v36 = vadd.f32 %v1525_v34, %v1194_v32  ;;  %v1216_v34 = vld [vmem:[#allocation2] sm:$0xff] }
 0x234   : > { %v1529_v37 = vpop.f32.mrf.mxu1 }
 0x235   : > { %1739 = vst [vmem:[#allocation2 + $0x48] sm:$0xff] %v1675_v36  ;;  %v1676_v41 = vadd.f32 %v1529_v37, %v1195_v35  ;;  %v1217_v37 = vld [vmem:[#allocation2 + $0xf0] sm:$0xff] }
 0x236   : > { %v1531_v42 = vpop.f32.mrf.mxu1 }
 0x237   : > { %1740 = vst [vmem:[#allocation2 + $0x180] sm:$0xff] %v1676_v41  ;;  %v1677_v44 = vadd.f32 %v1531_v42, %v1196_v38  ;;  %v1218_v42 = vld [vmem:[#allocation2 + $0x8] sm:$0xff] }
 0x238   : > { %v1533_v45 = vpop.f32.mrf.mxu1 }
 0x239   : > { %1741 = vst [vmem:[#allocation2 + $0x110] sm:$0xff] %v1677_v44  ;;  %v1678_v47 = vadd.f32 %v1533_v45, %v1197_v43  ;;  %v1219_v45 = vld [vmem:[#allocation2 + $0x148] sm:$0xff] }
 0x23a   : > { %v1535_v48 = vpop.f32.mrf.mxu1 }
 0x23b   : > { %1742 = vst [vmem:[#allocation2 + $0x118] sm:$0xff] %v1678_v47  ;;  %v1679_v50 = vadd.f32 %v1535_v48, %v1198_v46  ;;  %v1220_v48 = vld [vmem:[#allocation2 + $0x1d0] sm:$0xff] }
 0x23c   : > { %v1539_v51 = vpop.f32.mrf.mxu1 }
 0x23d   : > { %1743 = vst [vmem:[#allocation2 + $0x98] sm:$0xff] %v1679_v50  ;;  %v1680_v53 = vadd.f32 %v1539_v51, %v1199_v49  ;;  %v1221_v51 = vld [vmem:[#allocation2 + $0x100] sm:$0xff] }
 0x23e   : > { %v1541_v54 = vpop.f32.mrf.mxu1 }
 0x23f   : > { %1744 = vst [vmem:[#allocation2 + $0x120] sm:$0xff] %v1680_v53  ;;  %v1681_v56 = vadd.f32 %v1541_v54, %v1200_v52  ;;  %v1222_v54 = vld [vmem:[#allocation2 + $0xc8] sm:$0xff] }
 0x240   : > { %v1543_v57 = vpop.f32.mrf.mxu1 }
 0x241   : > { %1745 = vst [vmem:[#allocation2 + $0x150] sm:$0xff] %v1681_v56  ;;  %v1682_v59 = vadd.f32 %v1543_v57, %v1201_v55  ;;  %v1223_v57 = vld [vmem:[#allocation2 + $0x40] sm:$0xff] }
 0x242   : > { %v1545_v60 = vpop.f32.mrf.mxu1 }
 0x243   : > { %1746 = vst [vmem:[#allocation2 + $0x108] sm:$0xff] %v1682_v59  ;;  %v1683_v62 = vadd.f32 %v1545_v60, %v1202_v58  ;;  %v1224_v60 = vld [vmem:[#allocation2 + $0x1f8] sm:$0xff] }
 0x244   : > { %v1549_v63 = vpop.f32.mrf.mxu1 }
 0x245   : > { %1747 = vst [vmem:[#allocation2 + $0x60] sm:$0xff] %v1683_v62  ;;  %v1684_v1 = vadd.f32 %v1549_v63, %v1203_v61  ;;  %v1225_v63 = vld [vmem:[#allocation2 + $0x20] sm:$0xff] }
 0x246   : > { %v1551_v2 = vpop.f32.mrf.mxu1 }
 0x247   : > { %1748 = vst [vmem:[#allocation2 + $0xe0] sm:$0xff] %v1684_v1  ;;  %v1685_v4 = vadd.f32 %v1551_v2, %v1204_v0  ;;  %v1226_v2 = vld [vmem:[#allocation2 + $0x128] sm:$0xff] }
 0x248   : > { %v1553_v5 = vpop.f32.mrf.mxu1 }
 0x249   : > { %1749 = vst [vmem:[#allocation2 + $0x188] sm:$0xff] %v1685_v4  ;;  %v1686_v7 = vadd.f32 %v1553_v5, %v1205_v3  ;;  %v1227_v5 = vld [vmem:[#allocation2 + $0x1a0] sm:$0xff] }
 0x24a   : > { %v1555_v8 = vpop.f32.mrf.mxu1 }
 0x24b   : > { %1750 = vst [vmem:[#allocation2 + $0x138] sm:$0xff] %v1686_v7  ;;  %v1687_v10 = vadd.f32 %v1555_v8, %v1206_v6  ;;  %v1228_v8 = vld [vmem:[#allocation2 + $0x1f0] sm:$0xff] }
 0x24c   : > { %v1559_v11 = vpop.f32.mrf.mxu1 }
 0x24d   : > { %1751 = vst [vmem:[#allocation2 + $0x140] sm:$0xff] %v1687_v10  ;;  %v1688_v13 = vadd.f32 %v1559_v11, %v1207_v9  ;;  %v1229_v11 = vld [vmem:[#allocation2 + $0xe8] sm:$0xff] }
 0x24e   : > { %v1561_v14 = vpop.f32.mrf.mxu1 }
 0x24f   : > { %1752 = vst [vmem:[#allocation2 + $0x80] sm:$0xff] %v1688_v13  ;;  %v1689_v16 = vadd.f32 %v1561_v14, %v1208_v12  ;;  %v1230_v14 = vld [vmem:[#allocation2 + $0x78] sm:$0xff] }
 0x250   : > { %v1563_v17 = vpop.f32.mrf.mxu1 }
 0x251   : > { %1753 = vst [vmem:[#allocation2 + $0x1a8] sm:$0xff] %v1689_v16  ;;  %v1690_v19 = vadd.f32 %v1563_v17, %v1209_v15  ;;  %v1231_v17 = vld [vmem:[#allocation2 + $0x70] sm:$0xff] }
 0x252   : > { %v1565_v40 = vpop.f32.mrf.mxu1 }
 0x253   : > { %1754 = vst [vmem:[#allocation2 + $0x1b8] sm:$0xff] %v1690_v19  ;;  %v1691_v21 = vadd.f32 %v1565_v40, %v1210_v18  ;;  %v1232_v40 = vld [vmem:[#allocation2 + $0x90] sm:$0xff] }
 0x254   : > { %v1569_v39 = vpop.f32.mrf.mxu1 }
 0x255   : > { %1755 = vst [vmem:[#allocation2 + $0x28] sm:$0xff] %v1691_v21  ;;  %v1692_v23 = vadd.f32 %v1569_v39, %v1211_v20  ;;  %v1233_v39 = vld [vmem:[#allocation2 + $0x1d8] sm:$0xff] }
 0x256   : > { %v1571_v24 = vpop.f32.mrf.mxu1 }
 0x257   : > { %1756 = vst [vmem:[#allocation2 + $0x1e8] sm:$0xff] %v1692_v23  ;;  %v1693_v26 = vadd.f32 %v1571_v24, %v1212_v22  ;;  %v1234_v24 = vld [vmem:[#allocation2 + $0xd0] sm:$0xff] }
 0x258   : > { %v1573_v27 = vpop.f32.mrf.mxu1 }
 0x259   : > { %1757 = vst [vmem:[#allocation2 + $0xf8] sm:$0xff] %v1693_v26  ;;  %v1694_v29 = vadd.f32 %v1573_v27, %v1213_v25  ;;  %v1235_v27 = vld [vmem:[#allocation2 + $0xb8] sm:$0xff] }
 0x25a   : > { %v1575_v30 = vpop.f32.mrf.mxu1 }
 0x25b   : > { %1758 = vst [vmem:[#allocation2 + $0x160] sm:$0xff] %v1694_v29  ;;  %v1695_v32 = vadd.f32 %v1575_v30, %v1214_v28  ;;  %v1236_v30 = vld [vmem:[#allocation2 + $0x88] sm:$0xff] }
 0x25c   : > { %v1579_v33 = vpop.f32.mrf.mxu1 }
 0x25d   : > { %1759 = vst [vmem:[#allocation2 + $0x30] sm:$0xff] %v1695_v32  ;;  %v1696_v35 = vadd.f32 %v1579_v33, %v1215_v31  ;;  %v1237_v33 = vld [vmem:[#allocation2 + $0xa8] sm:$0xff] }
 0x25e   : > { %v1581_v36 = vpop.f32.mrf.mxu1 }
 0x25f   : > { %1760 = vst [vmem:[#allocation2 + $0x1e0] sm:$0xff] %v1696_v35  ;;  %v1697_v38 = vadd.f32 %v1581_v36, %v1216_v34  ;;  %v1238_v36 = vld [vmem:[#allocation2 + $0x1c8] sm:$0xff] }
 0x260   : > { %v1583_v41 = vpop.f32.mrf.mxu1 }
 0x261   : > { %1761 = vst [vmem:[#allocation2] sm:$0xff] %v1697_v38  ;;  %v1698_v43 = vadd.f32 %v1583_v41, %v1217_v37  ;;  %v1239_v41 = vld [vmem:[#allocation2 + $0x170] sm:$0xff] }
 0x262   : > { %v1585_v44 = vpop.f32.mrf.mxu1 }
 0x263   : > { %1762 = vst [vmem:[#allocation2 + $0xf0] sm:$0xff] %v1698_v43  ;;  %v1699_v46 = vadd.f32 %v1585_v44, %v1218_v42  ;;  %v1240_v44 = vld [vmem:[#allocation2 + $0x178] sm:$0xff] }
 0x264   : > { %v1589_v47 = vpop.f32.mrf.mxu1 }
 0x265   : > { %1763 = vst [vmem:[#allocation2 + $0x8] sm:$0xff] %v1699_v46  ;;  %v1700_v49 = vadd.f32 %v1589_v47, %v1219_v45  ;;  %v1241_v47 = vld [vmem:[#allocation2 + $0x68] sm:$0xff] }
 0x266   : > { %v1591_v50 = vpop.f32.mrf.mxu1 }
 0x267   : > { %1764 = vst [vmem:[#allocation2 + $0x148] sm:$0xff] %v1700_v49  ;;  %v1701_v52 = vadd.f32 %v1591_v50, %v1220_v48  ;;  %v1242_v50 = vld [vmem:[#allocation2 + $0x190] sm:$0xff] }
 0x268   : > { %v1593_v53 = vpop.f32.mrf.mxu1 }
 0x269   : > { %1765 = vst [vmem:[#allocation2 + $0x1d0] sm:$0xff] %v1701_v52  ;;  %v1702_v55 = vadd.f32 %v1593_v53, %v1221_v51  ;;  %v1243_v53 = vld [vmem:[#allocation2 + $0x198] sm:$0xff] }
 0x26a   : > { %v1595_v56 = vpop.f32.mrf.mxu1 }
 0x26b   : > { %1766 = vst [vmem:[#allocation2 + $0x100] sm:$0xff] %v1702_v55  ;;  %v1703_v58 = vadd.f32 %v1595_v56, %v1222_v54  ;;  %v1244_v56 = vld [vmem:[#allocation2 + $0x38] sm:$0xff] }
 0x26c   : > { %v1599_v59 = vpop.f32.mrf.mxu1 }
 0x26d   : > { %1767 = vst [vmem:[#allocation2 + $0xc8] sm:$0xff] %v1703_v58  ;;  %v1704_v61 = vadd.f32 %v1599_v59, %v1223_v57  ;;  %v1245_v59 = vld [vmem:[#allocation2 + $0xc0] sm:$0xff] }
 0x26e   : > { %v1601_v62 = vpop.f32.mrf.mxu1 }
 0x26f   : > { %1768 = vst [vmem:[#allocation2 + $0x40] sm:$0xff] %v1704_v61  ;;  %v1705_v0 = vadd.f32 %v1601_v62, %v1224_v60  ;;  %v1246_v62 = vld [vmem:[#allocation2 + $0x1c0] sm:$0xff] }
 0x270   : > { %v1603_v1 = vpop.f32.mrf.mxu1 }
 0x271   : > { %1769 = vst [vmem:[#allocation2 + $0x1f8] sm:$0xff] %v1705_v0  ;;  %v1706_v3 = vadd.f32 %v1603_v1, %v1225_v63  ;;  %v1247_v1 = vld [vmem:[#allocation2 + $0x158] sm:$0xff] }
 0x272   : > { %v1605_v4 = vpop.f32.mrf.mxu1 }
 0x273   : > { %1770 = vst [vmem:[#allocation2 + $0x20] sm:$0xff] %v1706_v3  ;;  %v1707_v6 = vadd.f32 %v1605_v4, %v1226_v2  ;;  %v1248_v4 = vld [vmem:[#allocation2 + $0x10] sm:$0xff] }
 0x274   : > { %v1609_v7 = vpop.f32.mrf.mxu1 }
 0x275   : > { %1771 = vst [vmem:[#allocation2 + $0x128] sm:$0xff] %v1707_v6  ;;  %v1708_v9 = vadd.f32 %v1609_v7, %v1227_v5  ;;  %v1249_v7 = vld [vmem:[#allocation2 + $0x58] sm:$0xff] }
 0x276   : > { %v1611_v10 = vpop.f32.mrf.mxu1 }
 0x277   : > { %1772 = vst [vmem:[#allocation2 + $0x1a0] sm:$0xff] %v1708_v9  ;;  %v1709_v12 = vadd.f32 %v1611_v10, %v1228_v8  ;;  %v1250_v10 = vld [vmem:[#allocation2 + $0xa0] sm:$0xff] }
 0x278   : > { %v1613_v13 = vpop.f32.mrf.mxu1 }
 0x279   : > { %1773 = vst [vmem:[#allocation2 + $0x1f0] sm:$0xff] %v1709_v12  ;;  %v1710_v15 = vadd.f32 %v1613_v13, %v1229_v11 }
 0x27a   : > { %v1615_v16 = vpop.f32.mrf.mxu1 }
 0x27b   : > { %1774 = vst [vmem:[#allocation2 + $0xe8] sm:$0xff] %v1710_v15  ;;  %v1711_v18 = vadd.f32 %v1615_v16, %v1230_v14 }
 0x27c   : > { %v1619_v19 = vpop.f32.mrf.mxu1 }
 0x27d   : > { %1775 = vst [vmem:[#allocation2 + $0x78] sm:$0xff] %v1711_v18  ;;  %v1712_v20 = vadd.f32 %v1619_v19, %v1231_v17 }
 0x27e   : > { %v1621_v21 = vpop.f32.mrf.mxu1 }
 0x27f   : > { %1776 = vst [vmem:[#allocation2 + $0x70] sm:$0xff] %v1712_v20  ;;  %v1713_v22 = vadd.f32 %v1621_v21, %v1232_v40 }
 0x280   : > { %v1623_v23 = vpop.f32.mrf.mxu1 }
 0x281   : > { %1777 = vst [vmem:[#allocation2 + $0x90] sm:$0xff] %v1713_v22  ;;  %v1714_v25 = vadd.f32 %v1623_v23, %v1233_v39 }
 0x282   : > { %v1625_v26 = vpop.f32.mrf.mxu1 }
 0x283   : > { %1778 = vst [vmem:[#allocation2 + $0x1d8] sm:$0xff] %v1714_v25  ;;  %v1715_v28 = vadd.f32 %v1625_v26, %v1234_v24 }
 0x284   : > { %v1629_v29 = vpop.f32.mrf.mxu1 }
 0x285   : > { %1779 = vst [vmem:[#allocation2 + $0xd0] sm:$0xff] %v1715_v28  ;;  %v1716_v31 = vadd.f32 %v1629_v29, %v1235_v27 }
 0x286   : > { %v1631_v32 = vpop.f32.mrf.mxu1 }
 0x287   : > { %1780 = vst [vmem:[#allocation2 + $0xb8] sm:$0xff] %v1716_v31  ;;  %v1717_v34 = vadd.f32 %v1631_v32, %v1236_v30 }
 0x288   : > { %v1633_v35 = vpop.f32.mrf.mxu1 }
 0x289   : > { %1781 = vst [vmem:[#allocation2 + $0x88] sm:$0xff] %v1717_v34  ;;  %v1718_v37 = vadd.f32 %v1633_v35, %v1237_v33 }
 0x28a   : > { %v1635_v38 = vpop.f32.mrf.mxu1 }
 0x28b   : > { %1782 = vst [vmem:[#allocation2 + $0xa8] sm:$0xff] %v1718_v37  ;;  %v1719_v42 = vadd.f32 %v1635_v38, %v1238_v36 }
 0x28c   : > { %v1639_v43 = vpop.f32.mrf.mxu1 }
 0x28d   : > { %1783 = vst [vmem:[#allocation2 + $0x1c8] sm:$0xff] %v1719_v42  ;;  %v1720_v45 = vadd.f32 %v1639_v43, %v1239_v41 }
 0x28e   : > { %v1641_v46 = vpop.f32.mrf.mxu1 }
 0x28f   : > { %1784 = vst [vmem:[#allocation2 + $0x170] sm:$0xff] %v1720_v45  ;;  %v1721_v48 = vadd.f32 %v1641_v46, %v1240_v44 }
 0x290   : > { %v1643_v49 = vpop.f32.mrf.mxu1 }
 0x291   : > { %1785 = vst [vmem:[#allocation2 + $0x178] sm:$0xff] %v1721_v48  ;;  %v1722_v51 = vadd.f32 %v1643_v49, %v1241_v47 }
 0x292   : > { %v1645_v52 = vpop.f32.mrf.mxu1 }
 0x293   : > { %1786 = vst [vmem:[#allocation2 + $0x68] sm:$0xff] %v1722_v51  ;;  %v1723_v54 = vadd.f32 %v1645_v52, %v1242_v50 }
 0x294   : > { %v1649_v55 = vpop.f32.mrf.mxu1 }
 0x295   : > { %1787 = vst [vmem:[#allocation2 + $0x190] sm:$0xff] %v1723_v54  ;;  %v1724_v57 = vadd.f32 %v1649_v55, %v1243_v53 }
 0x296   : > { %v1651_v58 = vpop.f32.mrf.mxu1 }
 0x297   : > { %1788 = vst [vmem:[#allocation2 + $0x198] sm:$0xff] %v1724_v57  ;;  %v1725_v60 = vadd.f32 %v1651_v58, %v1244_v56 }
 0x298   : > { %v1653_v61 = vpop.f32.mrf.mxu1 }
 0x299   : > { %1789 = vst [vmem:[#allocation2 + $0x38] sm:$0xff] %v1725_v60  ;;  %v1726_v63 = vadd.f32 %v1653_v61, %v1245_v59 }
 0x29a   : > { %v1655_v0 = vpop.f32.mrf.mxu1 }
 0x29b   : > { %1790 = vst [vmem:[#allocation2 + $0xc0] sm:$0xff] %v1726_v63  ;;  %v1727_v2 = vadd.f32 %v1655_v0, %v1246_v62 }
 0x29c   : > { %v1659_v3 = vpop.f32.mrf.mxu1 }
 0x29d   : > { %1791 = vst [vmem:[#allocation2 + $0x1c0] sm:$0xff] %v1727_v2  ;;  %v1728_v5 = vadd.f32 %v1659_v3, %v1247_v1 }
 0x29e   : > { %v1661_v6 = vpop.f32.mrf.mxu1 }
 0x29f   : > { %1792 = vst [vmem:[#allocation2 + $0x158] sm:$0xff] %v1728_v5  ;;  %v1729_v8 = vadd.f32 %v1661_v6, %v1248_v4 }
 0x2a0   : > { %v1663_v9 = vpop.f32.mrf.mxu1 }
 0x2a1   : > { %1793 = vst [vmem:[#allocation2 + $0x10] sm:$0xff] %v1729_v8  ;;  %v1730_v11 = vadd.f32 %v1663_v9, %v1249_v7 }
 0x2a2   : > { %v1665_v12 = vpop.f32.mrf.mxu1 }
 0x2a3   : > { %1794 = vst [vmem:[#allocation2 + $0x58] sm:$0xff] %v1730_v11  ;;  %v1731_v13 = vadd.f32 %v1665_v12, %v1250_v10 }
 0x2a5   : > { %1795 = vst [vmem:[#allocation2 + $0xa0] sm:$0xff] %v1731_v13 }
 0x2a6 PF: > { %1797 = sbr.rel (!%p461_p5) target bundleno = 870 (0x366), region = 56  ;;  %v1940_v14 = vld [vmem:[%s3099_s29 + $0x10] sm:$0xff] (%p461_p5)  ;;  %v1938_v15 = vld [vmem:[%s3099_s29] sm:$0xff] (%p461_p5)  ;;  %v3018_v16 = vmov (%p461_p5), 0   ;;  %v1941_v17 = vld [vmem:[%s3099_s29 + $0x18] sm:$0xff] (%p461_p5)  ;;  %v1864_v47 = vlaneseq (%p461_p5) }
 0x2a7   : > { %2964 = vset.pattern.permute.xlu1 (%p461_p5), %v3018_v16  ;;  %2963 = vset.pattern.permute.xlu0 (%p461_p5), %v3018_v16  ;;  %v1939_v18 = vld [vmem:[%s3099_s29 + $0x8] sm:$0xff] (%p461_p5)  ;;  %v1942_v40 = vld [vmem:[%s3099_s29 + $0x20] sm:$0xff] (%p461_p5)  ;;  %v1945_v20 = vld [vmem:[%s3099_s29 + $0x38] sm:$0xff] (%p461_p5) }
 0x2a8   : > { %1982 = vperm.xlu1 (%p461_p5), %2964, %v1940_v14   ;;  %1972 = vperm.xlu0 (%p461_p5), %2963, %v1938_v15   ;;  %v1943_v19 = vld [vmem:[%s3099_s29 + $0x28] sm:$0xff] (%p461_p5)  ;;  %v1944_v21 = vld [vmem:[%s3099_s29 + $0x30] sm:$0xff] (%p461_p5)  ;;  %v1946_v22 = vld [vmem:[%s3099_s29 + $0x40] sm:$0xff] (%p461_p5)  ;;  %v1865_v48 = vshrl.u32 (%p461_p5), %v1864_v47, 7 }
 0x2a9   : > { %v1947_v39 = vld [vmem:[%s3099_s29 + $0x48] sm:$0xff] (%p461_p5)  ;;  %v1949_v23 = vld [vmem:[%s3099_s29 + $0x58] sm:$0xff] (%p461_p5)  ;;  %v1948_v24 = vld [vmem:[%s3099_s29 + $0x50] sm:$0xff] (%p461_p5) }
 0x2aa   : > { %v1951_v25 = vld [vmem:[%s3099_s29 + $0x68] sm:$0xff] (%p461_p5)  ;;  %v1950_v26 = vld [vmem:[%s3099_s29 + $0x60] sm:$0xff] (%p461_p5)  ;;  %v1953_v27 = vld [vmem:[%s3099_s29 + $0x78] sm:$0xff] (%p461_p5)  ;;  %v1866_v49 = vsub.s32 (%p461_p5), 0, %v1865_v48  ;;  %v1870_v50 = vsub.s32 (%p461_p5), 1, %v1865_v48 }
 0x2ab   : > { %v1952_v28 = vld [vmem:[%s3099_s29 + $0x70] sm:$0xff]  ;;  %v1955_v29 = vld [vmem:[%s3099_s29 + $0x88] sm:$0xff]  ;;  %v1954_v30 = vld [vmem:[%s3099_s29 + $0x80] sm:$0xff] }
 0x2ac   : > { %1987 = vperm.xlu1 %2964, %v1941_v17   ;;  %1977 = vperm.xlu0 %2963, %v1939_v18   ;;  %v1957_v31 = vld [vmem:[%s3099_s29 + $0x98] sm:$0xff]  ;;  %v1956_v32 = vld [vmem:[%s3099_s29 + $0x90] sm:$0xff]  ;;  %v1959_v33 = vld [vmem:[%s3099_s29 + $0xa8] sm:$0xff] }
 0x2ad   : > { %v1958_v34 = vld [vmem:[%s3099_s29 + $0xa0] sm:$0xff]  ;;  %v1961_v35 = vld [vmem:[%s3099_s29 + $0xb8] sm:$0xff]  ;;  %v1960_v36 = vld [vmem:[%s3099_s29 + $0xb0] sm:$0xff] }
 0x2ae   : > { %v1963_v37 = vld [vmem:[%s3099_s29 + $0xc8] sm:$0xff]  ;;  %v1962_v38 = vld [vmem:[%s3099_s29 + $0xc0] sm:$0xff]  ;;  %v1965_v41 = vld [vmem:[%s3099_s29 + $0xd8] sm:$0xff] }
 0x2af   : > { %v1964_v42 = vld [vmem:[%s3099_s29 + $0xd0] sm:$0xff]  ;;  %v1967_v43 = vld [vmem:[%s3099_s29 + $0xe8] sm:$0xff]  ;;  %v1966_v44 = vld [vmem:[%s3099_s29 + $0xe0] sm:$0xff] }
 0x2b0   : > { %1997 = vperm.xlu1 %2964, %v1943_v19   ;;  %1992 = vperm.xlu0 %2963, %v1942_v40   ;;  %v1969_v45 = vld [vmem:[%s3099_s29 + $0xf8] sm:$0xff]  ;;  %v1968_v46 = vld [vmem:[%s3099_s29 + $0xf0] sm:$0xff]  ;;  %v1862_v51 = vld [vmem:[%s3125_s11] sm:$0x3] }
 0x2b1   : > { %v1802_v52 = vld [vmem:[#allocation2 + $0x50] sm:$0xff]  ;;  %v3396_v53 = vrot.slane %v1862_v51, %v1866_v49  ;;  %v3398_v54 = vrot.slane %v1862_v51, %v1870_v50  ;;  %v1803_v55 = vld [vmem:[#allocation2 + $0x168] sm:$0xff]  ;;  %v1800_v0 = vld [vmem:[#allocation2 + $0xd8] sm:$0xff] }
 0x2b2   : > { %v1798_v56 = vld [vmem:[#allocation2 + $0xb0] sm:$0xff]  ;;  %v1805_v63 = vld [vmem:[#allocation2 + $0x48] sm:$0xff]  ;;  %v1801_v1 = vld [vmem:[#allocation2 + $0x18] sm:$0xff] }
 0x2b3   : > { %v1799_v57 = vld [vmem:[#allocation2 + $0x1b0] sm:$0xff]  ;;  %v1878_v59 = vadd.f32 %v3396_v53, %v1802_v52  ;;  %v1879_v60 = vadd.f32 %v3398_v54, %v1803_v55  ;;  %v1874_v61 = vadd.f32 %v3396_v53, %v1798_v56  ;;  %v1881_v5 = vadd.f32 %v3398_v54, %v1805_v63  ;;  %v1808_v8 = vld [vmem:[#allocation2 + $0x118] sm:$0xff]  ;;  %v1806_v14 = vld [vmem:[#allocation2 + $0x180] sm:$0xff] }
 0x2b4   : > { %2007 = vperm.xlu1 %2964, %v1945_v20   ;;  %2002 = vperm.xlu0 %2963, %v1944_v21   ;;  %v1804_v58 = vld [vmem:[#allocation2 + $0x130] sm:$0xff]  ;;  %v1875_v62 = vadd.f32 %v3398_v54, %v1799_v57  ;;  %v1876_v6 = vadd.f32 %v3396_v53, %v1800_v0  ;;  %v1877_v7 = vadd.f32 %v3398_v54, %v1801_v1  ;;  %v1809_v13 = vld [vmem:[#allocation2 + $0x98] sm:$0xff]  ;;  %v1815_v47 = vld [vmem:[#allocation2 + $0x188] sm:$0xff] }
 0x2b5   : > { %v1880_v4 = vadd.f32 %v3396_v53, %v1804_v58  ;;  %v1807_v15 = vld [vmem:[#allocation2 + $0x110] sm:$0xff]  ;;  %v1884_v40 = vadd.f32 %v3396_v53, %v1808_v8  ;;  %v1885_v20 = vadd.f32 %v3398_v54, %v1809_v13  ;;  %v1882_v21 = vadd.f32 %v3396_v53, %v1806_v14  ;;  %v1820_v58 = vld [vmem:[#allocation2 + $0x1b8] sm:$0xff]  ;;  %v1821_v63 = vld [vmem:[#allocation2 + $0x28] sm:$0xff] }
 0x2b6   : > { %v1891_v57 = vadd.f32 %v3398_v54, %v1815_v47  ;;  %v1818_v0 = vld [vmem:[#allocation2 + $0x80] sm:$0xff]  ;;  %v1819_v1 = vld [vmem:[#allocation2 + $0x1a8] sm:$0xff] }
 0x2b7   : > { %v1894_v8 = vadd.f32 %v3396_v53, %v1818_v0  ;;  %v1833_v47 = vld [vmem:[#allocation2 + $0xc8] sm:$0xff] }
 0x2b8   : > { %2017 = vperm.xlu1 %2964, %v1947_v39   ;;  %2012 = vperm.xlu0 %2963, %v1946_v22   ;;  %v1883_v39 = vadd.f32 %v3398_v54, %v1807_v15  ;;  %v1812_v22 = vld [vmem:[#allocation2 + $0x108] sm:$0xff]  ;;  %v1825_v15 = vld [vmem:[#allocation2 + $0x30] sm:$0xff] }
 0x2bc   : > { %2027 = vperm.xlu1 %2964, %v1949_v23   ;;  %2022 = vperm.xlu0 %2963, %v1948_v24  }
 0x2c0   : > { %2037 = vperm.xlu1 %2964, %v1951_v25   ;;  %2032 = vperm.xlu0 %2963, %v1950_v26  }
 0x2c4   : > { %2047 = vperm.xlu1 %2964, %v1953_v27   ;;  %2042 = vperm.xlu0 %2963, %v1952_v28   ;;  %v1813_v27 = vld [vmem:[#allocation2 + $0x60] sm:$0xff] }
 0x2c5   : > { %v1810_v28 = vld [vmem:[#allocation2 + $0x120] sm:$0xff] }
 0x2c8   : > { %2057 = vperm.xlu1 %2964, %v1955_v29   ;;  %2052 = vperm.xlu0 %2963, %v1954_v30   ;;  %v1811_v29 = vld [vmem:[#allocation2 + $0x150] sm:$0xff] }
 0x2cc   : > { %2067 = vperm.xlu1 %2964, %v1957_v31   ;;  %2062 = vperm.xlu0 %2963, %v1956_v32  }
 0x2d0   : > { %2077 = vperm.xlu1 %2964, %v1959_v33   ;;  %2072 = vperm.xlu0 %2963, %v1958_v34   ;;  %v1888_v34 = vadd.f32 %v3396_v53, %v1812_v22 }
 0x2d4   : > { %2087 = vperm.xlu1 %2964, %v1961_v35   ;;  %2082 = vperm.xlu0 %2963, %v1960_v36   ;;  %v1889_v35 = vadd.f32 %v3398_v54, %v1813_v27  ;;  %v1886_v36 = vadd.f32 %v3396_v53, %v1810_v28 }
 0x2d8   : > { %2097 = vperm.xlu1 %2964, %v1963_v37   ;;  %2092 = vperm.xlu0 %2963, %v1962_v38   ;;  %v1887_v37 = vadd.f32 %v3398_v54, %v1811_v29  ;;  %v1816_v38 = vld [vmem:[#allocation2 + $0x138] sm:$0xff]  ;;  %v1829_v29 = vld [vmem:[#allocation2 + $0x8] sm:$0xff] }
 0x2d9   : > { %v1892_v52 = vadd.f32 %v3396_v53, %v1816_v38 }
 0x2dc   : > { %2107 = vperm.xlu1 %2964, %v1965_v41   ;;  %2102 = vperm.xlu0 %2963, %v1964_v42  }
 0x2e0   : > { %2117 = vperm.xlu1 %2964, %v1967_v43   ;;  %2112 = vperm.xlu0 %2963, %v1966_v44  }
 0x2e4   : > { %2127 = vperm.xlu1 %2964, %v1969_v45   ;;  %2122 = vperm.xlu0 %2963, %v1968_v46   ;;  %v1817_v45 = vld [vmem:[#allocation2 + $0x140] sm:$0xff] }
 0x2e5   : > { %v1814_v46 = vld [vmem:[#allocation2 + $0xe0] sm:$0xff]  ;;  %v1893_v55 = vadd.f32 %v3398_v54, %v1817_v45 }
 0x2e6   : > { %v1890_v56 = vadd.f32 %v3396_v53, %v1814_v46 }
 0x323   : > { %v1983_v2 = vpop.permute.xlu1 %1982  ;;  %v1973_v3 = vpop.permute.xlu0 %1972 }
 0x324   : > { %v2134_v9 = vmul.f32 %v1983_v2, %v1878_v59  ;;  %v2135_v10 = vmul.f32 %v1983_v2, %v1879_v60  ;;  %v2130_v11 = vmul.f32 %v1973_v3, %v1874_v61  ;;  %v2131_v12 = vmul.f32 %v1973_v3, %v1875_v62 }
 0x326   : > { %v2759_v16 = vpack.c.bf16 %v2135_v10, %v2134_v9  ;;  %v2757_v17 = vpack.c.bf16 %v2131_v12, %v2130_v11  ;;  %v1895_v9 = vadd.f32 %v3398_v54, %v1819_v1  ;;  %v1824_v10 = vld [vmem:[#allocation2 + $0x160] sm:$0xff]  ;;  %v1837_v1 = vld [vmem:[#allocation2 + $0x128] sm:$0xff] }
 0x327   : > { %v1988_v18 = vpop.permute.xlu1 %1987  ;;  %v1978_v19 = vpop.permute.xlu0 %1977 }
 0x328   : > { %2388 = vst [vmem:[%s3104_s10 + $0x10] sm:$0xff] %v2759_v16  ;;  %2386 = vst [vmem:[%s3104_s10] sm:$0xff] %v2757_v17  ;;  %v2136_v23 = vmul.f32 %v1988_v18, %v1880_v4  ;;  %v2137_v24 = vmul.f32 %v1988_v18, %v1881_v5  ;;  %v2132_v25 = vmul.f32 %v1978_v19, %v1876_v6  ;;  %v1822_v16 = vld [vmem:[#allocation2 + $0x1e8] sm:$0xff]  ;;  %v1823_v17 = vld [vmem:[#allocation2 + $0xf8] sm:$0xff] }
 0x329   : > { %v2133_v26 = vmul.f32 %v1978_v19, %v1877_v7  ;;  %v1896_v6 = vadd.f32 %v3396_v53, %v1820_v58  ;;  %v1897_v7 = vadd.f32 %v3398_v54, %v1821_v63  ;;  %v1898_v22 = vadd.f32 %v3396_v53, %v1822_v16 }
 0x32a   : > { %v2760_v30 = vpack.c.bf16 %v2137_v24, %v2136_v23  ;;  %v1899_v23 = vadd.f32 %v3398_v54, %v1823_v17  ;;  %v1828_v24 = vld [vmem:[#allocation2 + $0xf0] sm:$0xff]  ;;  %v1841_v17 = vld [vmem:[#allocation2 + $0x78] sm:$0xff] }
 0x32b   : > { %v2758_v31 = vpack.c.bf16 %v2133_v26, %v2132_v25  ;;  %v1998_v32 = vpop.permute.xlu1 %1997  ;;  %v1993_v33 = vpop.permute.xlu0 %1992 }
 0x32c   : > { %2389 = vst [vmem:[%s3104_s10 + $0x18] sm:$0xff] %v2760_v30  ;;  %v2140_v41 = vmul.f32 %v1998_v32, %v1884_v40  ;;  %v2141_v42 = vmul.f32 %v1998_v32, %v1885_v20  ;;  %v2138_v43 = vmul.f32 %v1993_v33, %v1882_v21  ;;  %v2139_v44 = vmul.f32 %v1993_v33, %v1883_v39  ;;  %v1826_v30 = vld [vmem:[#allocation2 + $0x1e0] sm:$0xff] }
 0x32d   : > { %2387 = vst [vmem:[%s3104_s10 + $0x8] sm:$0xff] %v2758_v31  ;;  %v1900_v21 = vadd.f32 %v3396_v53, %v1824_v10  ;;  %v1901_v39 = vadd.f32 %v3398_v54, %v1825_v15  ;;  %v1827_v31 = vld [vmem:[#allocation2] sm:$0xff]  ;;  %v1902_v38 = vadd.f32 %v3396_v53, %v1826_v30 }
 0x32e   : > { %v2762_v48 = vpack.c.bf16 %v2141_v42, %v2140_v41  ;;  %v2761_v49 = vpack.c.bf16 %v2139_v44, %v2138_v43  ;;  %v1903_v41 = vadd.f32 %v3398_v54, %v1827_v31  ;;  %v1832_v42 = vld [vmem:[#allocation2 + $0x100] sm:$0xff]  ;;  %v1845_v31 = vld [vmem:[#allocation2 + $0xd0] sm:$0xff] }
 0x32f   : > { %v2008_v50 = vpop.permute.xlu1 %2007  ;;  %v2003_v51 = vpop.permute.xlu0 %2002 }
 0x330   : > { %2391 = vst [vmem:[%s3104_s10 + $0x28] sm:$0xff] %v2762_v48  ;;  %2390 = vst [vmem:[%s3104_s10 + $0x20] sm:$0xff] %v2761_v49  ;;  %v2144_v59 = vmul.f32 %v2008_v50, %v1888_v34  ;;  %v2145_v60 = vmul.f32 %v2008_v50, %v1889_v35  ;;  %v2142_v61 = vmul.f32 %v2003_v51, %v1886_v36  ;;  %v1830_v48 = vld [vmem:[#allocation2 + $0x148] sm:$0xff]  ;;  %v1831_v49 = vld [vmem:[#allocation2 + $0x1d0] sm:$0xff] }
 0x331   : > { %v2143_v62 = vmul.f32 %v2003_v51, %v1887_v37  ;;  %v1904_v36 = vadd.f32 %v3396_v53, %v1828_v24  ;;  %v1905_v37 = vadd.f32 %v3398_v54, %v1829_v29  ;;  %v1906_v58 = vadd.f32 %v3396_v53, %v1830_v48 }
 0x332   : > { %v2764_v2 = vpack.c.bf16 %v2145_v60, %v2144_v59  ;;  %v1907_v59 = vadd.f32 %v3398_v54, %v1831_v49  ;;  %v1836_v60 = vld [vmem:[#allocation2 + $0x20] sm:$0xff]  ;;  %v1849_v49 = vld [vmem:[#allocation2 + $0x1c8] sm:$0xff] }
 0x333   : > { %v2763_v3 = vpack.c.bf16 %v2143_v62, %v2142_v61  ;;  %v2018_v4 = vpop.permute.xlu1 %2017  ;;  %v2013_v5 = vpop.permute.xlu0 %2012 }
 0x334   : > { %2393 = vst [vmem:[%s3104_s10 + $0x38] sm:$0xff] %v2764_v2  ;;  %v2148_v11 = vmul.f32 %v2018_v4, %v1892_v52  ;;  %v2149_v12 = vmul.f32 %v2018_v4, %v1893_v55  ;;  %v2146_v13 = vmul.f32 %v2013_v5, %v1890_v56  ;;  %v2147_v14 = vmul.f32 %v2013_v5, %v1891_v57  ;;  %v1834_v2 = vld [vmem:[#allocation2 + $0x40] sm:$0xff] }
 0x335   : > { %2392 = vst [vmem:[%s3104_s10 + $0x30] sm:$0xff] %v2763_v3  ;;  %v1908_v56 = vadd.f32 %v3396_v53, %v1832_v42  ;;  %v1909_v57 = vadd.f32 %v3398_v54, %v1833_v47  ;;  %v1835_v3 = vld [vmem:[#allocation2 + $0x1f8] sm:$0xff]  ;;  %v1910_v10 = vadd.f32 %v3396_v53, %v1834_v2 }
 0x336   : > { %v2766_v18 = vpack.c.bf16 %v2149_v12, %v2148_v11  ;;  %v2765_v19 = vpack.c.bf16 %v2147_v14, %v2146_v13  ;;  %v1911_v11 = vadd.f32 %v3398_v54, %v1835_v3  ;;  %v1840_v12 = vld [vmem:[#allocation2 + $0xe8] sm:$0xff]  ;;  %v1853_v3 = vld [vmem:[#allocation2 + $0x190] sm:$0xff] }
 0x337   : > { %v2028_v40 = vpop.permute.xlu1 %2027  ;;  %v2023_v20 = vpop.permute.xlu0 %2022 }
 0x338   : > { %2395 = vst [vmem:[%s3104_s10 + $0x48] sm:$0xff] %v2766_v18  ;;  %2394 = vst [vmem:[%s3104_s10 + $0x40] sm:$0xff] %v2765_v19  ;;  %v2152_v25 = vmul.f32 %v2028_v40, %v1896_v6  ;;  %v2153_v26 = vmul.f32 %v2028_v40, %v1897_v7  ;;  %v2150_v27 = vmul.f32 %v2023_v20, %v1894_v8  ;;  %v1838_v18 = vld [vmem:[#allocation2 + $0x1a0] sm:$0xff]  ;;  %v1839_v19 = vld [vmem:[#allocation2 + $0x1f0] sm:$0xff] }
 0x339   : > { %v2151_v28 = vmul.f32 %v2023_v20, %v1895_v9  ;;  %v1912_v8 = vadd.f32 %v3396_v53, %v1836_v60  ;;  %v1913_v9 = vadd.f32 %v3398_v54, %v1837_v1  ;;  %v1914_v24 = vadd.f32 %v3396_v53, %v1838_v18 }
 0x33a   : > { %v2768_v32 = vpack.c.bf16 %v2153_v26, %v2152_v25  ;;  %v1915_v25 = vadd.f32 %v3398_v54, %v1839_v19  ;;  %v1844_v26 = vld [vmem:[#allocation2 + $0x1d8] sm:$0xff]  ;;  %v1857_v19 = vld [vmem:[#allocation2 + $0x1c0] sm:$0xff] }
 0x33b   : > { %v2767_v33 = vpack.c.bf16 %v2151_v28, %v2150_v27  ;;  %v2038_v34 = vpop.permute.xlu1 %2037  ;;  %v2033_v35 = vpop.permute.xlu0 %2032 }
 0x33c   : > { %2397 = vst [vmem:[%s3104_s10 + $0x58] sm:$0xff] %v2768_v32  ;;  %v2156_v43 = vmul.f32 %v2038_v34, %v1900_v21  ;;  %v2157_v44 = vmul.f32 %v2038_v34, %v1901_v39  ;;  %v2154_v45 = vmul.f32 %v2033_v35, %v1898_v22  ;;  %v2155_v46 = vmul.f32 %v2033_v35, %v1899_v23  ;;  %v1842_v32 = vld [vmem:[#allocation2 + $0x70] sm:$0xff] }
 0x33d   : > { %2396 = vst [vmem:[%s3104_s10 + $0x50] sm:$0xff] %v2767_v33  ;;  %v1916_v22 = vadd.f32 %v3396_v53, %v1840_v12  ;;  %v1917_v23 = vadd.f32 %v3398_v54, %v1841_v17  ;;  %v1843_v33 = vld [vmem:[#allocation2 + $0x90] sm:$0xff]  ;;  %v1918_v42 = vadd.f32 %v3396_v53, %v1842_v32 }
 0x33e   : > { %v2770_v50 = vpack.c.bf16 %v2157_v44, %v2156_v43  ;;  %v2769_v51 = vpack.c.bf16 %v2155_v46, %v2154_v45  ;;  %v1919_v43 = vadd.f32 %v3398_v54, %v1843_v33  ;;  %v1848_v44 = vld [vmem:[#allocation2 + $0xa8] sm:$0xff]  ;;  %v1861_v33 = vld [vmem:[#allocation2 + $0xa0] sm:$0xff] }
 0x33f   : > { %v2048_v52 = vpop.permute.xlu1 %2047  ;;  %v2043_v55 = vpop.permute.xlu0 %2042 }
 0x340   : > { %2399 = vst [vmem:[%s3104_s10 + $0x68] sm:$0xff] %v2770_v50  ;;  %2398 = vst [vmem:[%s3104_s10 + $0x60] sm:$0xff] %v2769_v51  ;;  %v2160_v61 = vmul.f32 %v2048_v52, %v1904_v36  ;;  %v2161_v62 = vmul.f32 %v2048_v52, %v1905_v37  ;;  %v2158_v63 = vmul.f32 %v2043_v55, %v1902_v38  ;;  %v1846_v50 = vld [vmem:[#allocation2 + $0xb8] sm:$0xff]  ;;  %v1847_v51 = vld [vmem:[#allocation2 + $0x88] sm:$0xff] }
 0x341   : > { %v2159_v0 = vmul.f32 %v2043_v55, %v1903_v41  ;;  %v1920_v38 = vadd.f32 %v3396_v53, %v1844_v26  ;;  %v1921_v41 = vadd.f32 %v3398_v54, %v1845_v31  ;;  %v1922_v60 = vadd.f32 %v3396_v53, %v1846_v50 }
 0x342   : > { %v2772_v4 = vpack.c.bf16 %v2161_v62, %v2160_v61  ;;  %v1923_v61 = vadd.f32 %v3398_v54, %v1847_v51  ;;  %v1852_v62 = vld [vmem:[#allocation2 + $0x68] sm:$0xff] }
 0x343   : > { %v2771_v5 = vpack.c.bf16 %v2159_v0, %v2158_v63  ;;  %v2058_v6 = vpop.permute.xlu1 %2057  ;;  %v2053_v7 = vpop.permute.xlu0 %2052 }
 0x344   : > { %2401 = vst [vmem:[%s3104_s10 + $0x78] sm:$0xff] %v2772_v4  ;;  %v2164_v13 = vmul.f32 %v2058_v6, %v1908_v56  ;;  %v2165_v14 = vmul.f32 %v2058_v6, %v1909_v57  ;;  %v2162_v15 = vmul.f32 %v2053_v7, %v1906_v58  ;;  %v2163_v16 = vmul.f32 %v2053_v7, %v1907_v59  ;;  %v1850_v4 = vld [vmem:[#allocation2 + $0x170] sm:$0xff] }
 0x345   : > { %2400 = vst [vmem:[%s3104_s10 + $0x70] sm:$0xff] %v2771_v5  ;;  %v1924_v58 = vadd.f32 %v3396_v53, %v1848_v44  ;;  %v1925_v59 = vadd.f32 %v3398_v54, %v1849_v49  ;;  %v1851_v5 = vld [vmem:[#allocation2 + $0x178] sm:$0xff]  ;;  %v1926_v12 = vadd.f32 %v3396_v53, %v1850_v4 }
 0x346   : > { %v2774_v40 = vpack.c.bf16 %v2165_v14, %v2164_v13  ;;  %v2773_v20 = vpack.c.bf16 %v2163_v16, %v2162_v15  ;;  %v1927_v13 = vadd.f32 %v3398_v54, %v1851_v5  ;;  %v1856_v14 = vld [vmem:[#allocation2 + $0xc0] sm:$0xff] }
 0x347   : > { %v2068_v21 = vpop.permute.xlu1 %2067  ;;  %v2063_v39 = vpop.permute.xlu0 %2062 }
 0x348   : > { %2403 = vst [vmem:[%s3104_s10 + $0x88] sm:$0xff] %v2774_v40  ;;  %2402 = vst [vmem:[%s3104_s10 + $0x80] sm:$0xff] %v2773_v20  ;;  %v2168_v27 = vmul.f32 %v2068_v21, %v1912_v8  ;;  %v2169_v28 = vmul.f32 %v2068_v21, %v1913_v9  ;;  %v2166_v29 = vmul.f32 %v2063_v39, %v1910_v10  ;;  %v1854_v40 = vld [vmem:[#allocation2 + $0x198] sm:$0xff] }
 0x349   : > { %v2167_v30 = vmul.f32 %v2063_v39, %v1911_v11  ;;  %v1928_v10 = vadd.f32 %v3396_v53, %v1852_v62  ;;  %v1929_v11 = vadd.f32 %v3398_v54, %v1853_v3  ;;  %v1855_v20 = vld [vmem:[#allocation2 + $0x38] sm:$0xff]  ;;  %v1930_v26 = vadd.f32 %v3396_v53, %v1854_v40 }
 0x34a   : > { %v2776_v34 = vpack.c.bf16 %v2169_v28, %v2168_v27  ;;  %v1931_v27 = vadd.f32 %v3398_v54, %v1855_v20  ;;  %v1860_v28 = vld [vmem:[#allocation2 + $0x58] sm:$0xff] }
 0x34b   : > { %v2775_v35 = vpack.c.bf16 %v2167_v30, %v2166_v29  ;;  %v2078_v36 = vpop.permute.xlu1 %2077  ;;  %v2073_v37 = vpop.permute.xlu0 %2072 }
 0x34c   : > { %2405 = vst [vmem:[%s3104_s10 + $0x98] sm:$0xff] %v2776_v34  ;;  %v2172_v45 = vmul.f32 %v2078_v36, %v1916_v22  ;;  %v2173_v46 = vmul.f32 %v2078_v36, %v1917_v23  ;;  %v2170_v47 = vmul.f32 %v2073_v37, %v1914_v24  ;;  %v2171_v48 = vmul.f32 %v2073_v37, %v1915_v25  ;;  %v1858_v34 = vld [vmem:[#allocation2 + $0x158] sm:$0xff] }
 0x34d   : > { %2404 = vst [vmem:[%s3104_s10 + $0x90] sm:$0xff] %v2775_v35  ;;  %v1932_v24 = vadd.f32 %v3396_v53, %v1856_v14  ;;  %v1933_v25 = vadd.f32 %v3398_v54, %v1857_v19  ;;  %v1859_v35 = vld [vmem:[#allocation2 + $0x10] sm:$0xff]  ;;  %v1934_v44 = vadd.f32 %v3396_v53, %v1858_v34 }
 0x34e   : > { %v2778_v52 = vpack.c.bf16 %v2173_v46, %v2172_v45  ;;  %v2777_v55 = vpack.c.bf16 %v2171_v48, %v2170_v47  ;;  %v1935_v45 = vadd.f32 %v3398_v54, %v1859_v35 }
 0x34f   : > { %v2088_v56 = vpop.permute.xlu1 %2087  ;;  %v2083_v57 = vpop.permute.xlu0 %2082 }
 0x350   : > { %2407 = vst [vmem:[%s3104_s10 + $0xa8] sm:$0xff] %v2778_v52  ;;  %2406 = vst [vmem:[%s3104_s10 + $0xa0] sm:$0xff] %v2777_v55  ;;  %v2176_v63 = vmul.f32 %v2088_v56, %v1920_v38  ;;  %v2177_v0 = vmul.f32 %v2088_v56, %v1921_v41  ;;  %v2174_v1 = vmul.f32 %v2083_v57, %v1918_v42 }
 0x351   : > { %v2175_v2 = vmul.f32 %v2083_v57, %v1919_v43  ;;  %v1936_v42 = vadd.f32 %v3396_v53, %v1860_v28  ;;  %v1937_v43 = vadd.f32 %v3398_v54, %v1861_v33 }
 0x352   : > { %v2780_v6 = vpack.c.bf16 %v2177_v0, %v2176_v63 }
 0x353   : > { %v2779_v7 = vpack.c.bf16 %v2175_v2, %v2174_v1  ;;  %v2098_v8 = vpop.permute.xlu1 %2097  ;;  %v2093_v9 = vpop.permute.xlu0 %2092 }
 0x354   : > { %2409 = vst [vmem:[%s3104_s10 + $0xb8] sm:$0xff] %v2780_v6  ;;  %v2180_v15 = vmul.f32 %v2098_v8, %v1924_v58  ;;  %v2181_v16 = vmul.f32 %v2098_v8, %v1925_v59  ;;  %v2178_v17 = vmul.f32 %v2093_v9, %v1922_v60  ;;  %v2179_v18 = vmul.f32 %v2093_v9, %v1923_v61 }
 0x355   : > { %2408 = vst [vmem:[%s3104_s10 + $0xb0] sm:$0xff] %v2779_v7 }
 0x356   : > { %v2782_v21 = vpack.c.bf16 %v2181_v16, %v2180_v15  ;;  %v2781_v39 = vpack.c.bf16 %v2179_v18, %v2178_v17 }
 0x357   : > { %v2108_v22 = vpop.permute.xlu1 %2107  ;;  %v2103_v23 = vpop.permute.xlu0 %2102 }
 0x358   : > { %2411 = vst [vmem:[%s3104_s10 + $0xc8] sm:$0xff] %v2782_v21  ;;  %2410 = vst [vmem:[%s3104_s10 + $0xc0] sm:$0xff] %v2781_v39  ;;  %v2184_v29 = vmul.f32 %v2108_v22, %v1928_v10  ;;  %v2185_v30 = vmul.f32 %v2108_v22, %v1929_v11  ;;  %v2182_v31 = vmul.f32 %v2103_v23, %v1926_v12 }
 0x359   : > { %v2183_v32 = vmul.f32 %v2103_v23, %v1927_v13 }
 0x35a   : > { %v2784_v36 = vpack.c.bf16 %v2185_v30, %v2184_v29 }
 0x35b   : > { %v2783_v37 = vpack.c.bf16 %v2183_v32, %v2182_v31  ;;  %v2118_v38 = vpop.permute.xlu1 %2117  ;;  %v2113_v41 = vpop.permute.xlu0 %2112 }
 0x35c   : > { %2413 = vst [vmem:[%s3104_s10 + $0xd8] sm:$0xff] %v2784_v36  ;;  %v2188_v46 = vmul.f32 %v2118_v38, %v1932_v24  ;;  %v2189_v47 = vmul.f32 %v2118_v38, %v1933_v25  ;;  %v2186_v48 = vmul.f32 %v2113_v41, %v1930_v26  ;;  %v2187_v49 = vmul.f32 %v2113_v41, %v1931_v27 }
 0x35d   : > { %2412 = vst [vmem:[%s3104_s10 + $0xd0] sm:$0xff] %v2783_v37 }
 0x35e   : > { %v2786_v50 = vpack.c.bf16 %v2189_v47, %v2188_v46  ;;  %v2785_v51 = vpack.c.bf16 %v2187_v49, %v2186_v48 }
 0x35f   : > { %v2128_v52 = vpop.permute.xlu1 %2127  ;;  %v2123_v55 = vpop.permute.xlu0 %2122 }
 0x360   : > { %2415 = vst [vmem:[%s3104_s10 + $0xe8] sm:$0xff] %v2786_v50  ;;  %2414 = vst [vmem:[%s3104_s10 + $0xe0] sm:$0xff] %v2785_v51  ;;  %v2192_v56 = vmul.f32 %v2128_v52, %v1936_v42  ;;  %v2193_v57 = vmul.f32 %v2128_v52, %v1937_v43  ;;  %v2190_v58 = vmul.f32 %v2123_v55, %v1934_v44 }
 0x361   : > { %v2191_v53 = vmul.f32 %v2123_v55, %v1935_v45 }
 0x362   : > { %v2788_v59 = vpack.c.bf16 %v2193_v57, %v2192_v56 }
 0x363   : > { %v2787_v54 = vpack.c.bf16 %v2191_v53, %v2190_v58 }
 0x364   : > { %2417 = vst [vmem:[%s3104_s10 + $0xf8] sm:$0xff] %v2788_v59 }
 0x365   : > { %2416 = vst [vmem:[%s3104_s10 + $0xf0] sm:$0xff] %v2787_v54 }
 0x366 PF: > { %2422 = sbr.rel (!%p2620_p6) target bundleno = 887 (0x377), region = 60  ;;  %v3019_v60 = vmov (%p2620_p6), 0  }
 0x367   : > { %2423 = vst [vmem:[%s3104_s10] sm:$0xff] (%p2620_p6), %v3019_v60  ;;  %2424 = vst [vmem:[%s3104_s10 + $0x8] sm:$0xff] (%p2620_p6), %v3019_v60 }
 0x368   : > { %2425 = vst [vmem:[%s3104_s10 + $0x10] sm:$0xff] (%p2620_p6), %v3019_v60  ;;  %2426 = vst [vmem:[%s3104_s10 + $0x18] sm:$0xff] (%p2620_p6), %v3019_v60 }
 0x369   : > { %2427 = vst [vmem:[%s3104_s10 + $0x20] sm:$0xff] (%p2620_p6), %v3019_v60  ;;  %2428 = vst [vmem:[%s3104_s10 + $0x28] sm:$0xff] (%p2620_p6), %v3019_v60 }
 0x36a   : > { %2429 = vst [vmem:[%s3104_s10 + $0x30] sm:$0xff] (%p2620_p6), %v3019_v60  ;;  %2430 = vst [vmem:[%s3104_s10 + $0x38] sm:$0xff] (%p2620_p6), %v3019_v60 }
 0x36b   : > { %2431 = vst [vmem:[%s3104_s10 + $0x40] sm:$0xff] %v3019_v60  ;;  %2432 = vst [vmem:[%s3104_s10 + $0x48] sm:$0xff] %v3019_v60 }
 0x36c   : > { %2433 = vst [vmem:[%s3104_s10 + $0x50] sm:$0xff] %v3019_v60  ;;  %2434 = vst [vmem:[%s3104_s10 + $0x58] sm:$0xff] %v3019_v60 }
 0x36d   : > { %2435 = vst [vmem:[%s3104_s10 + $0x60] sm:$0xff] %v3019_v60  ;;  %2436 = vst [vmem:[%s3104_s10 + $0x68] sm:$0xff] %v3019_v60 }
 0x36e   : > { %2437 = vst [vmem:[%s3104_s10 + $0x70] sm:$0xff] %v3019_v60  ;;  %2438 = vst [vmem:[%s3104_s10 + $0x78] sm:$0xff] %v3019_v60 }
 0x36f   : > { %2439 = vst [vmem:[%s3104_s10 + $0x80] sm:$0xff] %v3019_v60  ;;  %2440 = vst [vmem:[%s3104_s10 + $0x88] sm:$0xff] %v3019_v60 }
 0x370   : > { %2441 = vst [vmem:[%s3104_s10 + $0x90] sm:$0xff] %v3019_v60  ;;  %2442 = vst [vmem:[%s3104_s10 + $0x98] sm:$0xff] %v3019_v60 }
 0x371   : > { %2443 = vst [vmem:[%s3104_s10 + $0xa0] sm:$0xff] %v3019_v60  ;;  %2444 = vst [vmem:[%s3104_s10 + $0xa8] sm:$0xff] %v3019_v60 }
 0x372   : > { %2445 = vst [vmem:[%s3104_s10 + $0xb0] sm:$0xff] %v3019_v60  ;;  %2446 = vst [vmem:[%s3104_s10 + $0xb8] sm:$0xff] %v3019_v60 }
 0x373   : > { %2447 = vst [vmem:[%s3104_s10 + $0xc0] sm:$0xff] %v3019_v60  ;;  %2448 = vst [vmem:[%s3104_s10 + $0xc8] sm:$0xff] %v3019_v60 }
 0x374   : > { %2449 = vst [vmem:[%s3104_s10 + $0xd0] sm:$0xff] %v3019_v60  ;;  %2450 = vst [vmem:[%s3104_s10 + $0xd8] sm:$0xff] %v3019_v60 }
 0x375   : > { %2451 = vst [vmem:[%s3104_s10 + $0xe0] sm:$0xff] %v3019_v60  ;;  %2452 = vst [vmem:[%s3104_s10 + $0xe8] sm:$0xff] %v3019_v60 }
 0x376   : > { %2453 = vst [vmem:[%s3104_s10 + $0xf0] sm:$0xff] %v3019_v60  ;;  %2454 = vst [vmem:[%s3104_s10 + $0xf8] sm:$0xff] %v3019_v60 }
 0x377 PF: > { %s28_s15 = sadd.s32 1, %s3013_s15   ;;  %s3548_s1 = smov %s3009_s14 }
 0x378   : > { %p25_p7 = scmp.ge.s32.totalorder %s28_s15, 7   ;;  %s3549_s14 = smov %s3551_s16 }
 0x37a   :  { %27 = sbr.rel (!%p25_p7) target bundleno = 27 (0x1b), region = 105 }

</bundles_post_ra>
